<compile_context>
chip_gen: v5e
topology: v5e:2x2
jax: 0.10.0
libtpu: 0.0.40
codegen_flags: <defaults>
</compile_context>

<pallas_src>
import functools

import jax
import jax.numpy as jnp
import numpy as np
from jax import lax
from jax.experimental import pallas as pl
from jax.experimental.pallas import tpu as pltpu

MATMUL_DTYPE = jnp.float32   # use jnp.bfloat16 at real channel counts (keep f32 accumulation)


def _block_kernel(x_ref, w1_ref, b1_ref, dw_ref, b2_ref, w3s_ref, b3s_ref, p1_ref,
                  mask_ref, o_ref, *, H, W, Bt):
    """Bt images per grid step; activations in (Cb, H*W) lane-dense layout."""
    Cb = w1_ref.shape[0]
    HW = H * W

    # Hoist constant loads out of the per-image loop (one VMEM read each).
    w1 = w1_ref[...].astype(MATMUL_DTYPE)
    w3s = w3s_ref[...].astype(MATMUL_DTYPE)    # (C, Cb): w3 rows spread onto odd rows
    p1 = p1_ref[...].astype(MATMUL_DTYPE)      # (C, Cb): identity -> even rows permutation
    b1 = b1_ref[...]
    b2 = b2_ref[...]
    b3s = b3s_ref[...]
    masks = [mask_ref[pl.ds(k, 1), :] for k in range(9)]   # each (1, HW), lane-dense

    for b in range(Bt):                        # static unroll over the batch tile
        x1 = x_ref[b, 0]                       # identity half   (Cb, HW)
        x2 = x_ref[b, 1]                       # branch2 input   (Cb, HW)

        # --- 1x1 conv (BN1 scale pre-folded) + bias + ReLU  (MXU) ---
        y = jnp.dot(w1, x2.astype(MATMUL_DTYPE), preferred_element_type=jnp.float32)
        y = jnp.maximum(y + b1, 0.0)

        # --- 3x3 depthwise conv, stride 1, pad 1 (BN2 scale pre-folded) ---
        # out[h, w] = sum_{dy,dx} w[dy,dx] * y[h+dy, w+dx].  In the flattened
        # (Cb, H*W) layout a (dy, dx) shift is a lane roll by dy*W + dx; wrapped /
        # out-of-image lanes are zeroed by a precomputed per-tap boundary mask.
        acc = jnp.zeros((Cb, HW), jnp.float32)
        k = 0
        for dy in (-1, 0, 1):
            for dx in (-1, 0, 1):
                d = dy * W + dx
                if d == 0:
                    v = y                                               # center tap
                else:
                    v = pltpu.roll(y, (-d) % HW, axis=1) * masks[k]     # (1, HW) mask
                acc = acc + v * dw_ref[k]                               # (Cb, 1) tap weight
                k += 1
        z = acc + b2

        # --- final 1x1 conv (BN3 pre-folded) + ReLU, with concat + channel_shuffle(2)
        #     folded into spread weights: one dense (C, HW) store per image. ---
        out = jnp.dot(w3s, z.astype(MATMUL_DTYPE), preferred_element_type=jnp.float32)
        out = jnp.maximum(out + b3s, 0.0)       # even rows are exactly 0 (zero weight rows)
        idp = jnp.dot(p1, x1.astype(MATMUL_DTYPE), preferred_element_type=jnp.float32)
        o_ref[b] = (idp + out).astype(o_ref.dtype)


def _dw_masks(H, W):
    """Per-tap validity masks (9, H*W) for the rolled depthwise conv."""
    pos = np.arange(H * W)
    row, col = pos // W, pos % W
    masks = []
    for dy in (-1, 0, 1):
        for dx in (-1, 0, 1):
            ok = np.ones(H * W, np.float32)
            if dy < 0:
                ok = ok * (row >= 1)
            if dy > 0:
                ok = ok * (row <= H - 2)
            if dx < 0:
                ok = ok * (col >= 1)
            if dx > 0:
                ok = ok * (col <= W - 2)
            masks.append(ok)
    return np.stack(masks).astype(np.float32)          # (9, H*W)


def _round_up(x, m):
    return -(-x // m) * m


def _padded_block_bytes(shape, itemsize=4):
    """VMEM bytes of a block after (8, 128) minor-dim padding."""
    if len(shape) == 1:
        lead, s, l = 1, 1, shape[0]
    else:
        lead = int(np.prod(shape[:-2])) if len(shape) > 2 else 1
        s, l = shape[-2], shape[-1]
    return lead * _round_up(s, 8) * _round_up(l, 128) * itemsize


@jax.jit
def inverted_residual_stride1(x_nchw, params):
    """Forward of InvertedResidual(inp=C, oup=C, stride=1) on NCHW input."""
    w1f, b1, dwf, b2, w3f, b3 = params
    N, C, H, W = x_nchw.shape
    Cb = C // 2
    HW = H * W

    # Fold channel_shuffle(groups=2) into the output side:
    #   post-shuffle channel 2c   <- identity half channel c  (P1 permutation rows)
    #   post-shuffle channel 2c+1 <- branch2 output channel c (w3 rows spread to odd rows)
    odd = jnp.arange(Cb) * 2 + 1
    w3s = jnp.zeros((C, Cb), w3f.dtype).at[odd].set(w3f)
    b3s = jnp.zeros((C, 1), b3.dtype).at[odd].set(b3)
    p1 = np.zeros((C, Cb), np.float32)
    p1[np.arange(Cb) * 2, np.arange(Cb)] = 1.0

    # Free contiguous reshape: group 0 = identity half, group 1 = branch2 input.
    x_r = x_nchw.reshape(N, 2, Cb, HW)
    masks = _dw_masks(H, W)                 # trace-time constant (9, HW)

    # Batch tile: largest divisor of N that keeps double-buffered blocks <= 16 MiB
    # and (when possible) leaves >= 2 grid steps for megacore sharding (v7x: 2 TCs).
    per_img = _padded_block_bytes((2, Cb, HW)) + _padded_block_bytes((C, HW))
    divs = [d for d in range(1, N + 1)
            if N % d == 0 and d <= 8 and 2 * d * per_img <= (16 << 20)]
    par = [d for d in divs if N // d >= 2]
    Bt = max(par) if par else max(divs)

    in_b = _padded_block_bytes((Bt, 2, Cb, HW))
    out_b = _padded_block_bytes((Bt, C, HW))
    const_b = sum(_padded_block_bytes(s) for s in
                  [(Cb, Cb), (Cb, 1), (9, Cb, 1), (Cb, 1),
                   (C, Cb), (C, 1), (C, Cb), (9, HW)])
    vmem_limit = int(min(32 << 20,                       # safe on v7x's 64 MiB / 2 TCs
                         2 * (in_b + out_b) + 2 * const_b + (8 << 20)))

    def const(shape):
        return pl.BlockSpec(shape, lambda b, _r=len(shape): (0,) * _r)

    out = pl.pallas_call(
        functools.partial(_block_kernel, H=H, W=W, Bt=Bt),
        out_shape=jax.ShapeDtypeStruct((N, C, HW), jnp.float32),
        grid=(N // Bt,),
        in_specs=[
            pl.BlockSpec((Bt, 2, Cb, HW), lambda b: (b, 0, 0, 0)),
            const((Cb, Cb)), const((Cb, 1)),        # conv1 weight / bias (BN folded)
            const((9, Cb, 1)), const((Cb, 1)),      # depthwise taps / bias (BN folded)
            const((C, Cb)), const((C, 1)),          # conv3 spread weight / bias (BN + shuffle folded)
            const((C, Cb)),                         # identity -> even-row permutation
            const((9, HW)),                         # depthwise boundary masks
        ],
        out_specs=pl.BlockSpec((Bt, C, HW), lambda b: (b, 0, 0)),
        compiler_params=pltpu.CompilerParams(
            dimension_semantics=("parallel",),      # batch-tile steps are independent
            vmem_limit_bytes=vmem_limit,
        ),
    )(x_r, w1f, b1, dwf, b2, w3s, b3s, p1, masks)

    # (N, C, H*W) is exactly the post-channel_shuffle NCHW memory order.
    return out.reshape(N, C, H, W)


# ---------------- parameter construction / folding (plain JAX glue) ----------------

def make_params(key, Cb):
    ks = jax.random.split(key, 6)

    def bn_params(k):
        kg, kb, km, kv = jax.random.split(k, 4)
        gamma = jax.random.uniform(kg, (Cb,), jnp.float32, 0.5, 1.5)
        beta = 0.1 * jax.random.normal(kb, (Cb,), jnp.float32)
        mean = 0.1 * jax.random.normal(km, (Cb,), jnp.float32)
        var = jax.random.uniform(kv, (Cb,), jnp.float32, 0.5, 1.5)
        return gamma, beta, mean, var

    w1 = 0.5 * jax.random.normal(ks[0], (Cb, Cb, 1, 1), jnp.float32)   # 1x1 conv (out,in,1,1)
    bn1 = bn_params(ks[1])
    dw = 0.5 * jax.random.normal(ks[2], (Cb, 1, 3, 3), jnp.float32)    # depthwise (out,1,3,3)
    bn2 = bn_params(ks[3])
    w3 = 0.5 * jax.random.normal(ks[4], (Cb, Cb, 1, 1), jnp.float32)
    bn3 = bn_params(ks[5])
    return w1, bn1, dw, bn2, w3, bn3


def fold_bn(gamma, beta, mean, var, eps=1e-5):
    s = gamma / jnp.sqrt(var + eps)
    b = beta - mean * s
    return s, b


# ---------------- pure-JAX reference (NCHW, mirrors the PyTorch forward) ----------------

def reference(x, w1, bn1, dw, bn2, w3, bn3):
    N, C, H, W = x.shape
    Cb = C // 2

    def bn(y, p):
        g, b, m, v = p
        sc = (g / jnp.sqrt(v + 1e-5))[None, :, None, None]
        return (y - m[None, :, None, None]) * sc + b[None, :, None, None]

    dn = ('NCHW', 'OIHW', 'NCHW')
    prec = lax.Precision.HIGHEST
    x1, x2 = x[:, :Cb], x[:, Cb:]
    y = lax.conv_general_dilated(x2, w1, (1, 1), 'VALID',
                                 dimension_numbers=dn, precision=prec)
    y = jax.nn.relu(bn(y, bn1))
    y = lax.conv_general_dilated(y, dw, (1, 1), ((1, 1), (1, 1)),
                                 dimension_numbers=dn, feature_group_count=Cb,
                                 precision=prec)
    y = bn(y, bn2)
    y = lax.conv_general_dilated(y, w3, (1, 1), 'VALID',
                                 dimension_numbers=dn, precision=prec)
    y = jax.nn.relu(bn(y, bn3))
    out = jnp.concatenate([x1, y], axis=1)
    out = out.reshape(N, 2, Cb, H, W).transpose(0, 2, 1, 3, 4).reshape(N, C, H, W)
    return out


if __name__ == "__main__":
    key = jax.random.PRNGKey(0)
    kx, kp = jax.random.split(key)
    N, C, H, W = 8, 4, 16, 16          # inp = oup = 4, stride = 1 -> branch_features = 2
    Cb = C // 2

    x = jax.random.normal(kx, (N, C, H, W), jnp.float32)
    w1, bn1, dw, bn2, w3, bn3 = make_params(kp, Cb)

    # Fold BN (inference) into per-channel scale/bias, then fold the scales
    # straight into the conv weights; the kernel only sees weights + biases.
    s1, b1 = fold_bn(*bn1)
    s2, b2 = fold_bn(*bn2)
    s3, b3 = fold_bn(*bn3)
    w1f = w1.reshape(Cb, Cb) * s1[:, None]                           # (out, in)
    w3f = w3.reshape(Cb, Cb) * s3[:, None]
    dwf = (dw.reshape(Cb, 9) * s2[:, None]).T.reshape(9, Cb, 1)      # per-tap (Cb, 1)
    params = (w1f, b1.reshape(Cb, 1), dwf, b2.reshape(Cb, 1),
              w3f, b3.reshape(Cb, 1))

    out = jax.block_until_ready(inverted_residual_stride1(x, params))
    ref = jax.block_until_ready(reference(x, w1, bn1, dw, bn2, w3, bn3))

    assert out.shape == ref.shape == (N, C, H, W)
    max_err = float(jnp.max(jnp.abs(out - ref)))
    assert jnp.allclose(out, ref, atol=5e-3, rtol=5e-3), f"max abs err {max_err}"
    print("KERNEL_OK")
</pallas_src>

<mosaic_0001>
module attributes {stable_mosaic.version = 11 : i64} {
  func.func @_block_kernel(%arg0: i32, %arg1: memref<4x2x2x256xf32, #tpu.memory_space<vmem>>, %arg2: memref<2x2xf32, #tpu.memory_space<vmem>>, %arg3: memref<2x1xf32, #tpu.memory_space<vmem>>, %arg4: memref<9x2x1xf32, #tpu.memory_space<vmem>>, %arg5: memref<2x1xf32, #tpu.memory_space<vmem>>, %arg6: memref<4x2xf32, #tpu.memory_space<vmem>>, %arg7: memref<4x1xf32, #tpu.memory_space<vmem>>, %arg8: memref<4x2xf32, #tpu.memory_space<vmem>>, %arg9: memref<9x256xf32, #tpu.memory_space<vmem>>, %arg10: memref<4x4x256xf32, #tpu.memory_space<vmem>>) attributes {dimension_semantics = [#tpu.dimension_semantics<parallel>], iteration_bounds = array<i64: 2>, scalar_prefetch = 0 : i64, scratch_operands = 0 : i64, tpu.core_type = #tpu.core_type<tc>, window_params = [{transform_indices = @transform_0, window_bounds = array<i64: 4, 2, 2, 256>}, {pipeline_mode = #tpu.pipeline_mode<synchronous>, transform_indices = @transform_1, window_bounds = array<i64: 2, 2>}, {pipeline_mode = #tpu.pipeline_mode<synchronous>, transform_indices = @transform_2, window_bounds = array<i64: 2, 1>}, {pipeline_mode = #tpu.pipeline_mode<synchronous>, transform_indices = @transform_3, window_bounds = array<i64: 9, 2, 1>}, {pipeline_mode = #tpu.pipeline_mode<synchronous>, transform_indices = @transform_4, window_bounds = array<i64: 2, 1>}, {pipeline_mode = #tpu.pipeline_mode<synchronous>, transform_indices = @transform_5, window_bounds = array<i64: 4, 2>}, {pipeline_mode = #tpu.pipeline_mode<synchronous>, transform_indices = @transform_6, window_bounds = array<i64: 4, 1>}, {pipeline_mode = #tpu.pipeline_mode<synchronous>, transform_indices = @transform_7, window_bounds = array<i64: 4, 2>}, {pipeline_mode = #tpu.pipeline_mode<synchronous>, transform_indices = @transform_8, window_bounds = array<i64: 9, 256>}, {transform_indices = @transform_9, window_bounds = array<i64: 4, 4, 256>}]} {
    %c0 = arith.constant 0 : index
    %c0_0 = arith.constant 0 : index
    %0 = vector.load %arg2[%c0, %c0_0] : memref<2x2xf32, #tpu.memory_space<vmem>>, vector<2x2xf32>
    %c0_1 = arith.constant 0 : index
    %c0_2 = arith.constant 0 : index
    %1 = vector.load %arg6[%c0_1, %c0_2] : memref<4x2xf32, #tpu.memory_space<vmem>>, vector<4x2xf32>
    %c0_3 = arith.constant 0 : index
    %c0_4 = arith.constant 0 : index
    %2 = vector.load %arg8[%c0_3, %c0_4] : memref<4x2xf32, #tpu.memory_space<vmem>>, vector<4x2xf32>
    %c0_5 = arith.constant 0 : index
    %c0_6 = arith.constant 0 : index
    %3 = vector.load %arg3[%c0_5, %c0_6] : memref<2x1xf32, #tpu.memory_space<vmem>>, vector<2x1xf32>
    %c0_7 = arith.constant 0 : index
    %c0_8 = arith.constant 0 : index
    %4 = vector.load %arg5[%c0_7, %c0_8] : memref<2x1xf32, #tpu.memory_space<vmem>>, vector<2x1xf32>
    %c0_9 = arith.constant 0 : index
    %c0_10 = arith.constant 0 : index
    %5 = vector.load %arg7[%c0_9, %c0_10] : memref<4x1xf32, #tpu.memory_space<vmem>>, vector<4x1xf32>
    %c0_11 = arith.constant 0 : index
    %c0_12 = arith.constant 0 : index
    %6 = vector.load %arg9[%c0_11, %c0_12] : memref<9x256xf32, #tpu.memory_space<vmem>>, vector<1x256xf32>
    %c1 = arith.constant 1 : index
    %c0_13 = arith.constant 0 : index
    %7 = vector.load %arg9[%c1, %c0_13] : memref<9x256xf32, #tpu.memory_space<vmem>>, vector<1x256xf32>
    %c2 = arith.constant 2 : index
    %c0_14 = arith.constant 0 : index
    %8 = vector.load %arg9[%c2, %c0_14] : memref<9x256xf32, #tpu.memory_space<vmem>>, vector<1x256xf32>
    %c3 = arith.constant 3 : index
    %c0_15 = arith.constant 0 : index
    %9 = vector.load %arg9[%c3, %c0_15] : memref<9x256xf32, #tpu.memory_space<vmem>>, vector<1x256xf32>
    %c5 = arith.constant 5 : index
    %c0_16 = arith.constant 0 : index
    %10 = vector.load %arg9[%c5, %c0_16] : memref<9x256xf32, #tpu.memory_space<vmem>>, vector<1x256xf32>
    %c6 = arith.constant 6 : index
    %c0_17 = arith.constant 0 : index
    %11 = vector.load %arg9[%c6, %c0_17] : memref<9x256xf32, #tpu.memory_space<vmem>>, vector<1x256xf32>
    %c7 = arith.constant 7 : index
    %c0_18 = arith.constant 0 : index
    %12 = vector.load %arg9[%c7, %c0_18] : memref<9x256xf32, #tpu.memory_space<vmem>>, vector<1x256xf32>
    %c8 = arith.constant 8 : index
    %c0_19 = arith.constant 0 : index
    %13 = vector.load %arg9[%c8, %c0_19] : memref<9x256xf32, #tpu.memory_space<vmem>>, vector<1x256xf32>
    %c0_20 = arith.constant 0 : index
    %c0_21 = arith.constant 0 : index
    %c0_22 = arith.constant 0 : index
    %c0_23 = arith.constant 0 : index
    %14 = vector.load %arg1[%c0_20, %c0_21, %c0_22, %c0_23] : memref<4x2x2x256xf32, #tpu.memory_space<vmem>>, vector<1x1x2x256xf32>
    %15 = vector.shape_cast %14 : vector<1x1x2x256xf32> to vector<2x256xf32>
    %c0_24 = arith.constant 0 : index
    %c1_25 = arith.constant 1 : index
    %c0_26 = arith.constant 0 : index
    %c0_27 = arith.constant 0 : index
    %16 = vector.load %arg1[%c0_24, %c1_25, %c0_26, %c0_27] : memref<4x2x2x256xf32, #tpu.memory_space<vmem>>, vector<1x1x2x256xf32>
    %17 = vector.shape_cast %16 : vector<1x1x2x256xf32> to vector<2x256xf32>
    %cst = arith.constant dense<0.000000e+00> : vector<2x256xf32>
    %18 = tpu.matmul %0, %17, %cst {dimension_numbers = #tpu.dot_dimension_numbers<[1], [0], [0], [1], [0, 0, 1, 1], [], []>} : vector<2x2xf32>, vector<2x256xf32>, vector<2x256xf32> -> vector<2x256xf32>
    %19 = vector.broadcast %3 : vector<2x1xf32> to vector<2x256xf32>
    %20 = arith.addf %18, %19 : vector<2x256xf32>
    %cst_28 = arith.constant 0.000000e+00 : f32
    %21 = vector.broadcast %cst_28 : f32 to vector<2x256xf32>
    %22 = arith.maximumf %20, %21 : vector<2x256xf32>
    %cst_29 = arith.constant 0.000000e+00 : f32
    %23 = vector.broadcast %cst_29 : f32 to vector<2x256xf32>
    %c17_i32 = arith.constant 17 : i32
    %24 = tpu.dynamic_rotate %22 by %c17_i32 dim 1 : vector<2x256xf32>, i32 -> vector<2x256xf32>
    %25 = vector.broadcast %6 : vector<1x256xf32> to vector<2x256xf32>
    %26 = arith.mulf %24, %25 : vector<2x256xf32>
    %c0_30 = arith.constant 0 : index
    %c0_31 = arith.constant 0 : index
    %c0_32 = arith.constant 0 : index
    %27 = vector.load %arg4[%c0_30, %c0_31, %c0_32] : memref<9x2x1xf32, #tpu.memory_space<vmem>>, vector<1x2x1xf32>
    %28 = vector.shape_cast %27 : vector<1x2x1xf32> to vector<2x1xf32>
    %29 = vector.broadcast %28 : vector<2x1xf32> to vector<2x256xf32>
    %30 = arith.mulf %26, %29 : vector<2x256xf32>
    %31 = arith.addf %23, %30 : vector<2x256xf32>
    %c16_i32 = arith.constant 16 : i32
    %32 = tpu.dynamic_rotate %22 by %c16_i32 dim 1 : vector<2x256xf32>, i32 -> vector<2x256xf32>
    %33 = vector.broadcast %7 : vector<1x256xf32> to vector<2x256xf32>
    %34 = arith.mulf %32, %33 : vector<2x256xf32>
    %c1_33 = arith.constant 1 : index
    %c0_34 = arith.constant 0 : index
    %c0_35 = arith.constant 0 : index
    %35 = vector.load %arg4[%c1_33, %c0_34, %c0_35] : memref<9x2x1xf32, #tpu.memory_space<vmem>>, vector<1x2x1xf32>
    %36 = vector.shape_cast %35 : vector<1x2x1xf32> to vector<2x1xf32>
    %37 = vector.broadcast %36 : vector<2x1xf32> to vector<2x256xf32>
    %38 = arith.mulf %34, %37 : vector<2x256xf32>
    %39 = arith.addf %31, %38 : vector<2x256xf32>
    %c15_i32 = arith.constant 15 : i32
    %40 = tpu.dynamic_rotate %22 by %c15_i32 dim 1 : vector<2x256xf32>, i32 -> vector<2x256xf32>
    %41 = vector.broadcast %8 : vector<1x256xf32> to vector<2x256xf32>
    %42 = arith.mulf %40, %41 : vector<2x256xf32>
    %c2_36 = arith.constant 2 : index
    %c0_37 = arith.constant 0 : index
    %c0_38 = arith.constant 0 : index
    %43 = vector.load %arg4[%c2_36, %c0_37, %c0_38] : memref<9x2x1xf32, #tpu.memory_space<vmem>>, vector<1x2x1xf32>
    %44 = vector.shape_cast %43 : vector<1x2x1xf32> to vector<2x1xf32>
    %45 = vector.broadcast %44 : vector<2x1xf32> to vector<2x256xf32>
    %46 = arith.mulf %42, %45 : vector<2x256xf32>
    %47 = arith.addf %39, %46 : vector<2x256xf32>
    %c1_i32 = arith.constant 1 : i32
    %48 = tpu.dynamic_rotate %22 by %c1_i32 dim 1 : vector<2x256xf32>, i32 -> vector<2x256xf32>
    %49 = vector.broadcast %9 : vector<1x256xf32> to vector<2x256xf32>
    %50 = arith.mulf %48, %49 : vector<2x256xf32>
    %c3_39 = arith.constant 3 : index
    %c0_40 = arith.constant 0 : index
    %c0_41 = arith.constant 0 : index
    %51 = vector.load %arg4[%c3_39, %c0_40, %c0_41] : memref<9x2x1xf32, #tpu.memory_space<vmem>>, vector<1x2x1xf32>
    %52 = vector.shape_cast %51 : vector<1x2x1xf32> to vector<2x1xf32>
    %53 = vector.broadcast %52 : vector<2x1xf32> to vector<2x256xf32>
    %54 = arith.mulf %50, %53 : vector<2x256xf32>
    %55 = arith.addf %47, %54 : vector<2x256xf32>
    %c4 = arith.constant 4 : index
    %c0_42 = arith.constant 0 : index
    %c0_43 = arith.constant 0 : index
    %56 = vector.load %arg4[%c4, %c0_42, %c0_43] : memref<9x2x1xf32, #tpu.memory_space<vmem>>, vector<1x2x1xf32>
    %57 = vector.shape_cast %56 : vector<1x2x1xf32> to vector<2x1xf32>
    %58 = vector.broadcast %57 : vector<2x1xf32> to vector<2x256xf32>
    %59 = arith.mulf %22, %58 : vector<2x256xf32>
    %60 = arith.addf %55, %59 : vector<2x256xf32>
    %c255_i32 = arith.constant 255 : i32
    %61 = tpu.dynamic_rotate %22 by %c255_i32 dim 1 : vector<2x256xf32>, i32 -> vector<2x256xf32>
    %62 = vector.broadcast %10 : vector<1x256xf32> to vector<2x256xf32>
    %63 = arith.mulf %61, %62 : vector<2x256xf32>
    %c5_44 = arith.constant 5 : index
    %c0_45 = arith.constant 0 : index
    %c0_46 = arith.constant 0 : index
    %64 = vector.load %arg4[%c5_44, %c0_45, %c0_46] : memref<9x2x1xf32, #tpu.memory_space<vmem>>, vector<1x2x1xf32>
    %65 = vector.shape_cast %64 : vector<1x2x1xf32> to vector<2x1xf32>
    %66 = vector.broadcast %65 : vector<2x1xf32> to vector<2x256xf32>
    %67 = arith.mulf %63, %66 : vector<2x256xf32>
    %68 = arith.addf %60, %67 : vector<2x256xf32>
    %c241_i32 = arith.constant 241 : i32
    %69 = tpu.dynamic_rotate %22 by %c241_i32 dim 1 : vector<2x256xf32>, i32 -> vector<2x256xf32>
    %70 = vector.broadcast %11 : vector<1x256xf32> to vector<2x256xf32>
    %71 = arith.mulf %69, %70 : vector<2x256xf32>
    %c6_47 = arith.constant 6 : index
    %c0_48 = arith.constant 0 : index
    %c0_49 = arith.constant 0 : index
    %72 = vector.load %arg4[%c6_47, %c0_48, %c0_49] : memref<9x2x1xf32, #tpu.memory_space<vmem>>, vector<1x2x1xf32>
    %73 = vector.shape_cast %72 : vector<1x2x1xf32> to vector<2x1xf32>
    %74 = vector.broadcast %73 : vector<2x1xf32> to vector<2x256xf32>
    %75 = arith.mulf %71, %74 : vector<2x256xf32>
    %76 = arith.addf %68, %75 : vector<2x256xf32>
    %c240_i32 = arith.constant 240 : i32
    %77 = tpu.dynamic_rotate %22 by %c240_i32 dim 1 : vector<2x256xf32>, i32 -> vector<2x256xf32>
    %78 = vector.broadcast %12 : vector<1x256xf32> to vector<2x256xf32>
    %79 = arith.mulf %77, %78 : vector<2x256xf32>
    %c7_50 = arith.constant 7 : index
    %c0_51 = arith.constant 0 : index
    %c0_52 = arith.constant 0 : index
    %80 = vector.load %arg4[%c7_50, %c0_51, %c0_52] : memref<9x2x1xf32, #tpu.memory_space<vmem>>, vector<1x2x1xf32>
    %81 = vector.shape_cast %80 : vector<1x2x1xf32> to vector<2x1xf32>
    %82 = vector.broadcast %81 : vector<2x1xf32> to vector<2x256xf32>
    %83 = arith.mulf %79, %82 : vector<2x256xf32>
    %84 = arith.addf %76, %83 : vector<2x256xf32>
    %c239_i32 = arith.constant 239 : i32
    %85 = tpu.dynamic_rotate %22 by %c239_i32 dim 1 : vector<2x256xf32>, i32 -> vector<2x256xf32>
    %86 = vector.broadcast %13 : vector<1x256xf32> to vector<2x256xf32>
    %87 = arith.mulf %85, %86 : vector<2x256xf32>
    %c8_53 = arith.constant 8 : index
    %c0_54 = arith.constant 0 : index
    %c0_55 = arith.constant 0 : index
    %88 = vector.load %arg4[%c8_53, %c0_54, %c0_55] : memref<9x2x1xf32, #tpu.memory_space<vmem>>, vector<1x2x1xf32>
    %89 = vector.shape_cast %88 : vector<1x2x1xf32> to vector<2x1xf32>
    %90 = vector.broadcast %89 : vector<2x1xf32> to vector<2x256xf32>
    %91 = arith.mulf %87, %90 : vector<2x256xf32>
    %92 = arith.addf %84, %91 : vector<2x256xf32>
    %93 = vector.broadcast %4 : vector<2x1xf32> to vector<2x256xf32>
    %94 = arith.addf %92, %93 : vector<2x256xf32>
    %cst_56 = arith.constant dense<0.000000e+00> : vector<4x256xf32>
    %95 = tpu.matmul %1, %94, %cst_56 {dimension_numbers = #tpu.dot_dimension_numbers<[1], [0], [0], [1], [0, 0, 1, 1], [], []>} : vector<4x2xf32>, vector<2x256xf32>, vector<4x256xf32> -> vector<4x256xf32>
    %96 = vector.broadcast %5 : vector<4x1xf32> to vector<4x256xf32>
    %97 = arith.addf %95, %96 : vector<4x256xf32>
    %cst_57 = arith.constant 0.000000e+00 : f32
    %98 = vector.broadcast %cst_57 : f32 to vector<4x256xf32>
    %99 = arith.maximumf %97, %98 : vector<4x256xf32>
    %cst_58 = arith.constant dense<0.000000e+00> : vector<4x256xf32>
    %100 = tpu.matmul %2, %15, %cst_58 {dimension_numbers = #tpu.dot_dimension_numbers<[1], [0], [0], [1], [0, 0, 1, 1], [], []>} : vector<4x2xf32>, vector<2x256xf32>, vector<4x256xf32> -> vector<4x256xf32>
    %101 = arith.addf %100, %99 : vector<4x256xf32>
    %c0_59 = arith.constant 0 : index
    %c0_60 = arith.constant 0 : index
    %c0_61 = arith.constant 0 : index
    %102 = vector.load %arg10[%c0_59, %c0_60, %c0_61] : memref<4x4x256xf32, #tpu.memory_space<vmem>>, vector<1x4x256xf32>
    %103 = vector.shape_cast %102 : vector<1x4x256xf32> to vector<4x256xf32>
    %104 = vector.shape_cast %101 : vector<4x256xf32> to vector<1x4x256xf32>
    tpu.vector_store %arg10[%c0_59, %c0_60, %c0_61], %104 {strides = array<i32>} : memref<4x4x256xf32, #tpu.memory_space<vmem>>, vector<1x4x256xf32>,
    %c1_62 = arith.constant 1 : index
    %c0_63 = arith.constant 0 : index
    %c0_64 = arith.constant 0 : index
    %c0_65 = arith.constant 0 : index
    %105 = vector.load %arg1[%c1_62, %c0_63, %c0_64, %c0_65] : memref<4x2x2x256xf32, #tpu.memory_space<vmem>>, vector<1x1x2x256xf32>
    %106 = vector.shape_cast %105 : vector<1x1x2x256xf32> to vector<2x256xf32>
    %c1_66 = arith.constant 1 : index
    %c1_67 = arith.constant 1 : index
    %c0_68 = arith.constant 0 : index
    %c0_69 = arith.constant 0 : index
    %107 = vector.load %arg1[%c1_66, %c1_67, %c0_68, %c0_69] : memref<4x2x2x256xf32, #tpu.memory_space<vmem>>, vector<1x1x2x256xf32>
    %108 = vector.shape_cast %107 : vector<1x1x2x256xf32> to vector<2x256xf32>
    %cst_70 = arith.constant dense<0.000000e+00> : vector<2x256xf32>
    %109 = tpu.matmul %0, %108, %cst_70 {dimension_numbers = #tpu.dot_dimension_numbers<[1], [0], [0], [1], [0, 0, 1, 1], [], []>} : vector<2x2xf32>, vector<2x256xf32>, vector<2x256xf32> -> vector<2x256xf32>
    %110 = vector.broadcast %3 : vector<2x1xf32> to vector<2x256xf32>
    %111 = arith.addf %109, %110 : vector<2x256xf32>
    %cst_71 = arith.constant 0.000000e+00 : f32
    %112 = vector.broadcast %cst_71 : f32 to vector<2x256xf32>
    %113 = arith.maximumf %111, %112 : vector<2x256xf32>
    %cst_72 = arith.constant 0.000000e+00 : f32
    %114 = vector.broadcast %cst_72 : f32 to vector<2x256xf32>
    %c17_i32_73 = arith.constant 17 : i32
    %115 = tpu.dynamic_rotate %113 by %c17_i32_73 dim 1 : vector<2x256xf32>, i32 -> vector<2x256xf32>
    %116 = vector.broadcast %6 : vector<1x256xf32> to vector<2x256xf32>
    %117 = arith.mulf %115, %116 : vector<2x256xf32>
    %c0_74 = arith.constant 0 : index
    %c0_75 = arith.constant 0 : index
    %c0_76 = arith.constant 0 : index
    %118 = vector.load %arg4[%c0_74, %c0_75, %c0_76] : memref<9x2x1xf32, #tpu.memory_space<vmem>>, vector<1x2x1xf32>
    %119 = vector.shape_cast %118 : vector<1x2x1xf32> to vector<2x1xf32>
    %120 = vector.broadcast %119 : vector<2x1xf32> to vector<2x256xf32>
    %121 = arith.mulf %117, %120 : vector<2x256xf32>
    %122 = arith.addf %114, %121 : vector<2x256xf32>
    %c16_i32_77 = arith.constant 16 : i32
    %123 = tpu.dynamic_rotate %113 by %c16_i32_77 dim 1 : vector<2x256xf32>, i32 -> vector<2x256xf32>
    %124 = vector.broadcast %7 : vector<1x256xf32> to vector<2x256xf32>
    %125 = arith.mulf %123, %124 : vector<2x256xf32>
    %c1_78 = arith.constant 1 : index
    %c0_79 = arith.constant 0 : index
    %c0_80 = arith.constant 0 : index
    %126 = vector.load %arg4[%c1_78, %c0_79, %c0_80] : memref<9x2x1xf32, #tpu.memory_space<vmem>>, vector<1x2x1xf32>
    %127 = vector.shape_cast %126 : vector<1x2x1xf32> to vector<2x1xf32>
    %128 = vector.broadcast %127 : vector<2x1xf32> to vector<2x256xf32>
    %129 = arith.mulf %125, %128 : vector<2x256xf32>
    %130 = arith.addf %122, %129 : vector<2x256xf32>
    %c15_i32_81 = arith.constant 15 : i32
    %131 = tpu.dynamic_rotate %113 by %c15_i32_81 dim 1 : vector<2x256xf32>, i32 -> vector<2x256xf32>
    %132 = vector.broadcast %8 : vector<1x256xf32> to vector<2x256xf32>
    %133 = arith.mulf %131, %132 : vector<2x256xf32>
    %c2_82 = arith.constant 2 : index
    %c0_83 = arith.constant 0 : index
    %c0_84 = arith.constant 0 : index
    %134 = vector.load %arg4[%c2_82, %c0_83, %c0_84] : memref<9x2x1xf32, #tpu.memory_space<vmem>>, vector<1x2x1xf32>
    %135 = vector.shape_cast %134 : vector<1x2x1xf32> to vector<2x1xf32>
    %136 = vector.broadcast %135 : vector<2x1xf32> to vector<2x256xf32>
    %137 = arith.mulf %133, %136 : vector<2x256xf32>
    %138 = arith.addf %130, %137 : vector<2x256xf32>
    %c1_i32_85 = arith.constant 1 : i32
    %139 = tpu.dynamic_rotate %113 by %c1_i32_85 dim 1 : vector<2x256xf32>, i32 -> vector<2x256xf32>
    %140 = vector.broadcast %9 : vector<1x256xf32> to vector<2x256xf32>
    %141 = arith.mulf %139, %140 : vector<2x256xf32>
    %c3_86 = arith.constant 3 : index
    %c0_87 = arith.constant 0 : index
    %c0_88 = arith.constant 0 : index
    %142 = vector.load %arg4[%c3_86, %c0_87, %c0_88] : memref<9x2x1xf32, #tpu.memory_space<vmem>>, vector<1x2x1xf32>
    %143 = vector.shape_cast %142 : vector<1x2x1xf32> to vector<2x1xf32>
    %144 = vector.broadcast %143 : vector<2x1xf32> to vector<2x256xf32>
    %145 = arith.mulf %141, %144 : vector<2x256xf32>
    %146 = arith.addf %138, %145 : vector<2x256xf32>
    %c4_89 = arith.constant 4 : index
    %c0_90 = arith.constant 0 : index
    %c0_91 = arith.constant 0 : index
    %147 = vector.load %arg4[%c4_89, %c0_90, %c0_91] : memref<9x2x1xf32, #tpu.memory_space<vmem>>, vector<1x2x1xf32>
    %148 = vector.shape_cast %147 : vector<1x2x1xf32> to vector<2x1xf32>
    %149 = vector.broadcast %148 : vector<2x1xf32> to vector<2x256xf32>
    %150 = arith.mulf %113, %149 : vector<2x256xf32>
    %151 = arith.addf %146, %150 : vector<2x256xf32>
    %c255_i32_92 = arith.constant 255 : i32
    %152 = tpu.dynamic_rotate %113 by %c255_i32_92 dim 1 : vector<2x256xf32>, i32 -> vector<2x256xf32>
    %153 = vector.broadcast %10 : vector<1x256xf32> to vector<2x256xf32>
    %154 = arith.mulf %152, %153 : vector<2x256xf32>
    %c5_93 = arith.constant 5 : index
    %c0_94 = arith.constant 0 : index
    %c0_95 = arith.constant 0 : index
    %155 = vector.load %arg4[%c5_93, %c0_94, %c0_95] : memref<9x2x1xf32, #tpu.memory_space<vmem>>, vector<1x2x1xf32>
    %156 = vector.shape_cast %155 : vector<1x2x1xf32> to vector<2x1xf32>
    %157 = vector.broadcast %156 : vector<2x1xf32> to vector<2x256xf32>
    %158 = arith.mulf %154, %157 : vector<2x256xf32>
    %159 = arith.addf %151, %158 : vector<2x256xf32>
    %c241_i32_96 = arith.constant 241 : i32
    %160 = tpu.dynamic_rotate %113 by %c241_i32_96 dim 1 : vector<2x256xf32>, i32 -> vector<2x256xf32>
    %161 = vector.broadcast %11 : vector<1x256xf32> to vector<2x256xf32>
    %162 = arith.mulf %160, %161 : vector<2x256xf32>
    %c6_97 = arith.constant 6 : index
    %c0_98 = arith.constant 0 : index
    %c0_99 = arith.constant 0 : index
    %163 = vector.load %arg4[%c6_97, %c0_98, %c0_99] : memref<9x2x1xf32, #tpu.memory_space<vmem>>, vector<1x2x1xf32>
    %164 = vector.shape_cast %163 : vector<1x2x1xf32> to vector<2x1xf32>
    %165 = vector.broadcast %164 : vector<2x1xf32> to vector<2x256xf32>
    %166 = arith.mulf %162, %165 : vector<2x256xf32>
    %167 = arith.addf %159, %166 : vector<2x256xf32>
    %c240_i32_100 = arith.constant 240 : i32
    %168 = tpu.dynamic_rotate %113 by %c240_i32_100 dim 1 : vector<2x256xf32>, i32 -> vector<2x256xf32>
    %169 = vector.broadcast %12 : vector<1x256xf32> to vector<2x256xf32>
    %170 = arith.mulf %168, %169 : vector<2x256xf32>
    %c7_101 = arith.constant 7 : index
    %c0_102 = arith.constant 0 : index
    %c0_103 = arith.constant 0 : index
    %171 = vector.load %arg4[%c7_101, %c0_102, %c0_103] : memref<9x2x1xf32, #tpu.memory_space<vmem>>, vector<1x2x1xf32>
    %172 = vector.shape_cast %171 : vector<1x2x1xf32> to vector<2x1xf32>
    %173 = vector.broadcast %172 : vector<2x1xf32> to vector<2x256xf32>
    %174 = arith.mulf %170, %173 : vector<2x256xf32>
    %175 = arith.addf %167, %174 : vector<2x256xf32>
    %c239_i32_104 = arith.constant 239 : i32
    %176 = tpu.dynamic_rotate %113 by %c239_i32_104 dim 1 : vector<2x256xf32>, i32 -> vector<2x256xf32>
    %177 = vector.broadcast %13 : vector<1x256xf32> to vector<2x256xf32>
    %178 = arith.mulf %176, %177 : vector<2x256xf32>
    %c8_105 = arith.constant 8 : index
    %c0_106 = arith.constant 0 : index
    %c0_107 = arith.constant 0 : index
    %179 = vector.load %arg4[%c8_105, %c0_106, %c0_107] : memref<9x2x1xf32, #tpu.memory_space<vmem>>, vector<1x2x1xf32>
    %180 = vector.shape_cast %179 : vector<1x2x1xf32> to vector<2x1xf32>
    %181 = vector.broadcast %180 : vector<2x1xf32> to vector<2x256xf32>
    %182 = arith.mulf %178, %181 : vector<2x256xf32>
    %183 = arith.addf %175, %182 : vector<2x256xf32>
    %184 = vector.broadcast %4 : vector<2x1xf32> to vector<2x256xf32>
    %185 = arith.addf %183, %184 : vector<2x256xf32>
    %cst_108 = arith.constant dense<0.000000e+00> : vector<4x256xf32>
    %186 = tpu.matmul %1, %185, %cst_108 {dimension_numbers = #tpu.dot_dimension_numbers<[1], [0], [0], [1], [0, 0, 1, 1], [], []>} : vector<4x2xf32>, vector<2x256xf32>, vector<4x256xf32> -> vector<4x256xf32>
    %187 = vector.broadcast %5 : vector<4x1xf32> to vector<4x256xf32>
    %188 = arith.addf %186, %187 : vector<4x256xf32>
    %cst_109 = arith.constant 0.000000e+00 : f32
    %189 = vector.broadcast %cst_109 : f32 to vector<4x256xf32>
    %190 = arith.maximumf %188, %189 : vector<4x256xf32>
    %cst_110 = arith.constant dense<0.000000e+00> : vector<4x256xf32>
    %191 = tpu.matmul %2, %106, %cst_110 {dimension_numbers = #tpu.dot_dimension_numbers<[1], [0], [0], [1], [0, 0, 1, 1], [], []>} : vector<4x2xf32>, vector<2x256xf32>, vector<4x256xf32> -> vector<4x256xf32>
    %192 = arith.addf %191, %190 : vector<4x256xf32>
    %c1_111 = arith.constant 1 : index
    %c0_112 = arith.constant 0 : index
    %c0_113 = arith.constant 0 : index
    %193 = vector.load %arg10[%c1_111, %c0_112, %c0_113] : memref<4x4x256xf32, #tpu.memory_space<vmem>>, vector<1x4x256xf32>
    %194 = vector.shape_cast %193 : vector<1x4x256xf32> to vector<4x256xf32>
    %195 = vector.shape_cast %192 : vector<4x256xf32> to vector<1x4x256xf32>
    tpu.vector_store %arg10[%c1_111, %c0_112, %c0_113], %195 {strides = array<i32>} : memref<4x4x256xf32, #tpu.memory_space<vmem>>, vector<1x4x256xf32>,
    %c2_114 = arith.constant 2 : index
    %c0_115 = arith.constant 0 : index
    %c0_116 = arith.constant 0 : index
    %c0_117 = arith.constant 0 : index
    %196 = vector.load %arg1[%c2_114, %c0_115, %c0_116, %c0_117] : memref<4x2x2x256xf32, #tpu.memory_space<vmem>>, vector<1x1x2x256xf32>
    %197 = vector.shape_cast %196 : vector<1x1x2x256xf32> to vector<2x256xf32>
    %c2_118 = arith.constant 2 : index
    %c1_119 = arith.constant 1 : index
    %c0_120 = arith.constant 0 : index
    %c0_121 = arith.constant 0 : index
    %198 = vector.load %arg1[%c2_118, %c1_119, %c0_120, %c0_121] : memref<4x2x2x256xf32, #tpu.memory_space<vmem>>, vector<1x1x2x256xf32>
    %199 = vector.shape_cast %198 : vector<1x1x2x256xf32> to vector<2x256xf32>
    %cst_122 = arith.constant dense<0.000000e+00> : vector<2x256xf32>
    %200 = tpu.matmul %0, %199, %cst_122 {dimension_numbers = #tpu.dot_dimension_numbers<[1], [0], [0], [1], [0, 0, 1, 1], [], []>} : vector<2x2xf32>, vector<2x256xf32>, vector<2x256xf32> -> vector<2x256xf32>
    %201 = vector.broadcast %3 : vector<2x1xf32> to vector<2x256xf32>
    %202 = arith.addf %200, %201 : vector<2x256xf32>
    %cst_123 = arith.constant 0.000000e+00 : f32
    %203 = vector.broadcast %cst_123 : f32 to vector<2x256xf32>
    %204 = arith.maximumf %202, %203 : vector<2x256xf32>
    %cst_124 = arith.constant 0.000000e+00 : f32
    %205 = vector.broadcast %cst_124 : f32 to vector<2x256xf32>
    %c17_i32_125 = arith.constant 17 : i32
    %206 = tpu.dynamic_rotate %204 by %c17_i32_125 dim 1 : vector<2x256xf32>, i32 -> vector<2x256xf32>
    %207 = vector.broadcast %6 : vector<1x256xf32> to vector<2x256xf32>
    %208 = arith.mulf %206, %207 : vector<2x256xf32>
    %c0_126 = arith.constant 0 : index
    %c0_127 = arith.constant 0 : index
    %c0_128 = arith.constant 0 : index
    %209 = vector.load %arg4[%c0_126, %c0_127, %c0_128] : memref<9x2x1xf32, #tpu.memory_space<vmem>>, vector<1x2x1xf32>
    %210 = vector.shape_cast %209 : vector<1x2x1xf32> to vector<2x1xf32>
    %211 = vector.broadcast %210 : vector<2x1xf32> to vector<2x256xf32>
    %212 = arith.mulf %208, %211 : vector<2x256xf32>
    %213 = arith.addf %205, %212 : vector<2x256xf32>
    %c16_i32_129 = arith.constant 16 : i32
    %214 = tpu.dynamic_rotate %204 by %c16_i32_129 dim 1 : vector<2x256xf32>, i32 -> vector<2x256xf32>
    %215 = vector.broadcast %7 : vector<1x256xf32> to vector<2x256xf32>
    %216 = arith.mulf %214, %215 : vector<2x256xf32>
    %c1_130 = arith.constant 1 : index
    %c0_131 = arith.constant 0 : index
    %c0_132 = arith.constant 0 : index
    %217 = vector.load %arg4[%c1_130, %c0_131, %c0_132] : memref<9x2x1xf32, #tpu.memory_space<vmem>>, vector<1x2x1xf32>
    %218 = vector.shape_cast %217 : vector<1x2x1xf32> to vector<2x1xf32>
    %219 = vector.broadcast %218 : vector<2x1xf32> to vector<2x256xf32>
    %220 = arith.mulf %216, %219 : vector<2x256xf32>
    %221 = arith.addf %213, %220 : vector<2x256xf32>
    %c15_i32_133 = arith.constant 15 : i32
    %222 = tpu.dynamic_rotate %204 by %c15_i32_133 dim 1 : vector<2x256xf32>, i32 -> vector<2x256xf32>
    %223 = vector.broadcast %8 : vector<1x256xf32> to vector<2x256xf32>
    %224 = arith.mulf %222, %223 : vector<2x256xf32>
    %c2_134 = arith.constant 2 : index
    %c0_135 = arith.constant 0 : index
    %c0_136 = arith.constant 0 : index
    %225 = vector.load %arg4[%c2_134, %c0_135, %c0_136] : memref<9x2x1xf32, #tpu.memory_space<vmem>>, vector<1x2x1xf32>
    %226 = vector.shape_cast %225 : vector<1x2x1xf32> to vector<2x1xf32>
    %227 = vector.broadcast %226 : vector<2x1xf32> to vector<2x256xf32>
    %228 = arith.mulf %224, %227 : vector<2x256xf32>
    %229 = arith.addf %221, %228 : vector<2x256xf32>
    %c1_i32_137 = arith.constant 1 : i32
    %230 = tpu.dynamic_rotate %204 by %c1_i32_137 dim 1 : vector<2x256xf32>, i32 -> vector<2x256xf32>
    %231 = vector.broadcast %9 : vector<1x256xf32> to vector<2x256xf32>
    %232 = arith.mulf %230, %231 : vector<2x256xf32>
    %c3_138 = arith.constant 3 : index
    %c0_139 = arith.constant 0 : index
    %c0_140 = arith.constant 0 : index
    %233 = vector.load %arg4[%c3_138, %c0_139, %c0_140] : memref<9x2x1xf32, #tpu.memory_space<vmem>>, vector<1x2x1xf32>
    %234 = vector.shape_cast %233 : vector<1x2x1xf32> to vector<2x1xf32>
    %235 = vector.broadcast %234 : vector<2x1xf32> to vector<2x256xf32>
    %236 = arith.mulf %232, %235 : vector<2x256xf32>
    %237 = arith.addf %229, %236 : vector<2x256xf32>
    %c4_141 = arith.constant 4 : index
    %c0_142 = arith.constant 0 : index
    %c0_143 = arith.constant 0 : index
    %238 = vector.load %arg4[%c4_141, %c0_142, %c0_143] : memref<9x2x1xf32, #tpu.memory_space<vmem>>, vector<1x2x1xf32>
    %239 = vector.shape_cast %238 : vector<1x2x1xf32> to vector<2x1xf32>
    %240 = vector.broadcast %239 : vector<2x1xf32> to vector<2x256xf32>
    %241 = arith.mulf %204, %240 : vector<2x256xf32>
    %242 = arith.addf %237, %241 : vector<2x256xf32>
    %c255_i32_144 = arith.constant 255 : i32
    %243 = tpu.dynamic_rotate %204 by %c255_i32_144 dim 1 : vector<2x256xf32>, i32 -> vector<2x256xf32>
    %244 = vector.broadcast %10 : vector<1x256xf32> to vector<2x256xf32>
    %245 = arith.mulf %243, %244 : vector<2x256xf32>
    %c5_145 = arith.constant 5 : index
    %c0_146 = arith.constant 0 : index
    %c0_147 = arith.constant 0 : index
    %246 = vector.load %arg4[%c5_145, %c0_146, %c0_147] : memref<9x2x1xf32, #tpu.memory_space<vmem>>, vector<1x2x1xf32>
    %247 = vector.shape_cast %246 : vector<1x2x1xf32> to vector<2x1xf32>
    %248 = vector.broadcast %247 : vector<2x1xf32> to vector<2x256xf32>
    %249 = arith.mulf %245, %248 : vector<2x256xf32>
    %250 = arith.addf %242, %249 : vector<2x256xf32>
    %c241_i32_148 = arith.constant 241 : i32
    %251 = tpu.dynamic_rotate %204 by %c241_i32_148 dim 1 : vector<2x256xf32>, i32 -> vector<2x256xf32>
    %252 = vector.broadcast %11 : vector<1x256xf32> to vector<2x256xf32>
    %253 = arith.mulf %251, %252 : vector<2x256xf32>
    %c6_149 = arith.constant 6 : index
    %c0_150 = arith.constant 0 : index
    %c0_151 = arith.constant 0 : index
    %254 = vector.load %arg4[%c6_149, %c0_150, %c0_151] : memref<9x2x1xf32, #tpu.memory_space<vmem>>, vector<1x2x1xf32>
    %255 = vector.shape_cast %254 : vector<1x2x1xf32> to vector<2x1xf32>
    %256 = vector.broadcast %255 : vector<2x1xf32> to vector<2x256xf32>
    %257 = arith.mulf %253, %256 : vector<2x256xf32>
    %258 = arith.addf %250, %257 : vector<2x256xf32>
    %c240_i32_152 = arith.constant 240 : i32
    %259 = tpu.dynamic_rotate %204 by %c240_i32_152 dim 1 : vector<2x256xf32>, i32 -> vector<2x256xf32>
    %260 = vector.broadcast %12 : vector<1x256xf32> to vector<2x256xf32>
    %261 = arith.mulf %259, %260 : vector<2x256xf32>
    %c7_153 = arith.constant 7 : index
    %c0_154 = arith.constant 0 : index
    %c0_155 = arith.constant 0 : index
    %262 = vector.load %arg4[%c7_153, %c0_154, %c0_155] : memref<9x2x1xf32, #tpu.memory_space<vmem>>, vector<1x2x1xf32>
    %263 = vector.shape_cast %262 : vector<1x2x1xf32> to vector<2x1xf32>
    %264 = vector.broadcast %263 : vector<2x1xf32> to vector<2x256xf32>
    %265 = arith.mulf %261, %264 : vector<2x256xf32>
    %266 = arith.addf %258, %265 : vector<2x256xf32>
    %c239_i32_156 = arith.constant 239 : i32
    %267 = tpu.dynamic_rotate %204 by %c239_i32_156 dim 1 : vector<2x256xf32>, i32 -> vector<2x256xf32>
    %268 = vector.broadcast %13 : vector<1x256xf32> to vector<2x256xf32>
    %269 = arith.mulf %267, %268 : vector<2x256xf32>
    %c8_157 = arith.constant 8 : index
    %c0_158 = arith.constant 0 : index
    %c0_159 = arith.constant 0 : index
    %270 = vector.load %arg4[%c8_157, %c0_158, %c0_159] : memref<9x2x1xf32, #tpu.memory_space<vmem>>, vector<1x2x1xf32>
    %271 = vector.shape_cast %270 : vector<1x2x1xf32> to vector<2x1xf32>
    %272 = vector.broadcast %271 : vector<2x1xf32> to vector<2x256xf32>
    %273 = arith.mulf %269, %272 : vector<2x256xf32>
    %274 = arith.addf %266, %273 : vector<2x256xf32>
    %275 = vector.broadcast %4 : vector<2x1xf32> to vector<2x256xf32>
    %276 = arith.addf %274, %275 : vector<2x256xf32>
    %cst_160 = arith.constant dense<0.000000e+00> : vector<4x256xf32>
    %277 = tpu.matmul %1, %276, %cst_160 {dimension_numbers = #tpu.dot_dimension_numbers<[1], [0], [0], [1], [0, 0, 1, 1], [], []>} : vector<4x2xf32>, vector<2x256xf32>, vector<4x256xf32> -> vector<4x256xf32>
    %278 = vector.broadcast %5 : vector<4x1xf32> to vector<4x256xf32>
    %279 = arith.addf %277, %278 : vector<4x256xf32>
    %cst_161 = arith.constant 0.000000e+00 : f32
    %280 = vector.broadcast %cst_161 : f32 to vector<4x256xf32>
    %281 = arith.maximumf %279, %280 : vector<4x256xf32>
    %cst_162 = arith.constant dense<0.000000e+00> : vector<4x256xf32>
    %282 = tpu.matmul %2, %197, %cst_162 {dimension_numbers = #tpu.dot_dimension_numbers<[1], [0], [0], [1], [0, 0, 1, 1], [], []>} : vector<4x2xf32>, vector<2x256xf32>, vector<4x256xf32> -> vector<4x256xf32>
    %283 = arith.addf %282, %281 : vector<4x256xf32>
    %c2_163 = arith.constant 2 : index
    %c0_164 = arith.constant 0 : index
    %c0_165 = arith.constant 0 : index
    %284 = vector.load %arg10[%c2_163, %c0_164, %c0_165] : memref<4x4x256xf32, #tpu.memory_space<vmem>>, vector<1x4x256xf32>
    %285 = vector.shape_cast %284 : vector<1x4x256xf32> to vector<4x256xf32>
    %286 = vector.shape_cast %283 : vector<4x256xf32> to vector<1x4x256xf32>
    tpu.vector_store %arg10[%c2_163, %c0_164, %c0_165], %286 {strides = array<i32>} : memref<4x4x256xf32, #tpu.memory_space<vmem>>, vector<1x4x256xf32>,
    %c3_166 = arith.constant 3 : index
    %c0_167 = arith.constant 0 : index
    %c0_168 = arith.constant 0 : index
    %c0_169 = arith.constant 0 : index
    %287 = vector.load %arg1[%c3_166, %c0_167, %c0_168, %c0_169] : memref<4x2x2x256xf32, #tpu.memory_space<vmem>>, vector<1x1x2x256xf32>
    %288 = vector.shape_cast %287 : vector<1x1x2x256xf32> to vector<2x256xf32>
    %c3_170 = arith.constant 3 : index
    %c1_171 = arith.constant 1 : index
    %c0_172 = arith.constant 0 : index
    %c0_173 = arith.constant 0 : index
    %289 = vector.load %arg1[%c3_170, %c1_171, %c0_172, %c0_173] : memref<4x2x2x256xf32, #tpu.memory_space<vmem>>, vector<1x1x2x256xf32>
    %290 = vector.shape_cast %289 : vector<1x1x2x256xf32> to vector<2x256xf32>
    %cst_174 = arith.constant dense<0.000000e+00> : vector<2x256xf32>
    %291 = tpu.matmul %0, %290, %cst_174 {dimension_numbers = #tpu.dot_dimension_numbers<[1], [0], [0], [1], [0, 0, 1, 1], [], []>} : vector<2x2xf32>, vector<2x256xf32>, vector<2x256xf32> -> vector<2x256xf32>
    %292 = vector.broadcast %3 : vector<2x1xf32> to vector<2x256xf32>
    %293 = arith.addf %291, %292 : vector<2x256xf32>
    %cst_175 = arith.constant 0.000000e+00 : f32
    %294 = vector.broadcast %cst_175 : f32 to vector<2x256xf32>
    %295 = arith.maximumf %293, %294 : vector<2x256xf32>
    %cst_176 = arith.constant 0.000000e+00 : f32
    %296 = vector.broadcast %cst_176 : f32 to vector<2x256xf32>
    %c17_i32_177 = arith.constant 17 : i32
    %297 = tpu.dynamic_rotate %295 by %c17_i32_177 dim 1 : vector<2x256xf32>, i32 -> vector<2x256xf32>
    %298 = vector.broadcast %6 : vector<1x256xf32> to vector<2x256xf32>
    %299 = arith.mulf %297, %298 : vector<2x256xf32>
    %c0_178 = arith.constant 0 : index
    %c0_179 = arith.constant 0 : index
    %c0_180 = arith.constant 0 : index
    %300 = vector.load %arg4[%c0_178, %c0_179, %c0_180] : memref<9x2x1xf32, #tpu.memory_space<vmem>>, vector<1x2x1xf32>
    %301 = vector.shape_cast %300 : vector<1x2x1xf32> to vector<2x1xf32>
    %302 = vector.broadcast %301 : vector<2x1xf32> to vector<2x256xf32>
    %303 = arith.mulf %299, %302 : vector<2x256xf32>
    %304 = arith.addf %296, %303 : vector<2x256xf32>
    %c16_i32_181 = arith.constant 16 : i32
    %305 = tpu.dynamic_rotate %295 by %c16_i32_181 dim 1 : vector<2x256xf32>, i32 -> vector<2x256xf32>
    %306 = vector.broadcast %7 : vector<1x256xf32> to vector<2x256xf32>
    %307 = arith.mulf %305, %306 : vector<2x256xf32>
    %c1_182 = arith.constant 1 : index
    %c0_183 = arith.constant 0 : index
    %c0_184 = arith.constant 0 : index
    %308 = vector.load %arg4[%c1_182, %c0_183, %c0_184] : memref<9x2x1xf32, #tpu.memory_space<vmem>>, vector<1x2x1xf32>
    %309 = vector.shape_cast %308 : vector<1x2x1xf32> to vector<2x1xf32>
    %310 = vector.broadcast %309 : vector<2x1xf32> to vector<2x256xf32>
    %311 = arith.mulf %307, %310 : vector<2x256xf32>
    %312 = arith.addf %304, %311 : vector<2x256xf32>
    %c15_i32_185 = arith.constant 15 : i32
    %313 = tpu.dynamic_rotate %295 by %c15_i32_185 dim 1 : vector<2x256xf32>, i32 -> vector<2x256xf32>
    %314 = vector.broadcast %8 : vector<1x256xf32> to vector<2x256xf32>
    %315 = arith.mulf %313, %314 : vector<2x256xf32>
    %c2_186 = arith.constant 2 : index
    %c0_187 = arith.constant 0 : index
    %c0_188 = arith.constant 0 : index
    %316 = vector.load %arg4[%c2_186, %c0_187, %c0_188] : memref<9x2x1xf32, #tpu.memory_space<vmem>>, vector<1x2x1xf32>
    %317 = vector.shape_cast %316 : vector<1x2x1xf32> to vector<2x1xf32>
    %318 = vector.broadcast %317 : vector<2x1xf32> to vector<2x256xf32>
    %319 = arith.mulf %315, %318 : vector<2x256xf32>
    %320 = arith.addf %312, %319 : vector<2x256xf32>
    %c1_i32_189 = arith.constant 1 : i32
    %321 = tpu.dynamic_rotate %295 by %c1_i32_189 dim 1 : vector<2x256xf32>, i32 -> vector<2x256xf32>
    %322 = vector.broadcast %9 : vector<1x256xf32> to vector<2x256xf32>
    %323 = arith.mulf %321, %322 : vector<2x256xf32>
    %c3_190 = arith.constant 3 : index
    %c0_191 = arith.constant 0 : index
    %c0_192 = arith.constant 0 : index
    %324 = vector.load %arg4[%c3_190, %c0_191, %c0_192] : memref<9x2x1xf32, #tpu.memory_space<vmem>>, vector<1x2x1xf32>
    %325 = vector.shape_cast %324 : vector<1x2x1xf32> to vector<2x1xf32>
    %326 = vector.broadcast %325 : vector<2x1xf32> to vector<2x256xf32>
    %327 = arith.mulf %323, %326 : vector<2x256xf32>
    %328 = arith.addf %320, %327 : vector<2x256xf32>
    %c4_193 = arith.constant 4 : index
    %c0_194 = arith.constant 0 : index
    %c0_195 = arith.constant 0 : index
    %329 = vector.load %arg4[%c4_193, %c0_194, %c0_195] : memref<9x2x1xf32, #tpu.memory_space<vmem>>, vector<1x2x1xf32>
    %330 = vector.shape_cast %329 : vector<1x2x1xf32> to vector<2x1xf32>
    %331 = vector.broadcast %330 : vector<2x1xf32> to vector<2x256xf32>
    %332 = arith.mulf %295, %331 : vector<2x256xf32>
    %333 = arith.addf %328, %332 : vector<2x256xf32>
    %c255_i32_196 = arith.constant 255 : i32
    %334 = tpu.dynamic_rotate %295 by %c255_i32_196 dim 1 : vector<2x256xf32>, i32 -> vector<2x256xf32>
    %335 = vector.broadcast %10 : vector<1x256xf32> to vector<2x256xf32>
    %336 = arith.mulf %334, %335 : vector<2x256xf32>
    %c5_197 = arith.constant 5 : index
    %c0_198 = arith.constant 0 : index
    %c0_199 = arith.constant 0 : index
    %337 = vector.load %arg4[%c5_197, %c0_198, %c0_199] : memref<9x2x1xf32, #tpu.memory_space<vmem>>, vector<1x2x1xf32>
    %338 = vector.shape_cast %337 : vector<1x2x1xf32> to vector<2x1xf32>
    %339 = vector.broadcast %338 : vector<2x1xf32> to vector<2x256xf32>
    %340 = arith.mulf %336, %339 : vector<2x256xf32>
    %341 = arith.addf %333, %340 : vector<2x256xf32>
    %c241_i32_200 = arith.constant 241 : i32
    %342 = tpu.dynamic_rotate %295 by %c241_i32_200 dim 1 : vector<2x256xf32>, i32 -> vector<2x256xf32>
    %343 = vector.broadcast %11 : vector<1x256xf32> to vector<2x256xf32>
    %344 = arith.mulf %342, %343 : vector<2x256xf32>
    %c6_201 = arith.constant 6 : index
    %c0_202 = arith.constant 0 : index
    %c0_203 = arith.constant 0 : index
    %345 = vector.load %arg4[%c6_201, %c0_202, %c0_203] : memref<9x2x1xf32, #tpu.memory_space<vmem>>, vector<1x2x1xf32>
    %346 = vector.shape_cast %345 : vector<1x2x1xf32> to vector<2x1xf32>
    %347 = vector.broadcast %346 : vector<2x1xf32> to vector<2x256xf32>
    %348 = arith.mulf %344, %347 : vector<2x256xf32>
    %349 = arith.addf %341, %348 : vector<2x256xf32>
    %c240_i32_204 = arith.constant 240 : i32
    %350 = tpu.dynamic_rotate %295 by %c240_i32_204 dim 1 : vector<2x256xf32>, i32 -> vector<2x256xf32>
    %351 = vector.broadcast %12 : vector<1x256xf32> to vector<2x256xf32>
    %352 = arith.mulf %350, %351 : vector<2x256xf32>
    %c7_205 = arith.constant 7 : index
    %c0_206 = arith.constant 0 : index
    %c0_207 = arith.constant 0 : index
    %353 = vector.load %arg4[%c7_205, %c0_206, %c0_207] : memref<9x2x1xf32, #tpu.memory_space<vmem>>, vector<1x2x1xf32>
    %354 = vector.shape_cast %353 : vector<1x2x1xf32> to vector<2x1xf32>
    %355 = vector.broadcast %354 : vector<2x1xf32> to vector<2x256xf32>
    %356 = arith.mulf %352, %355 : vector<2x256xf32>
    %357 = arith.addf %349, %356 : vector<2x256xf32>
    %c239_i32_208 = arith.constant 239 : i32
    %358 = tpu.dynamic_rotate %295 by %c239_i32_208 dim 1 : vector<2x256xf32>, i32 -> vector<2x256xf32>
    %359 = vector.broadcast %13 : vector<1x256xf32> to vector<2x256xf32>
    %360 = arith.mulf %358, %359 : vector<2x256xf32>
    %c8_209 = arith.constant 8 : index
    %c0_210 = arith.constant 0 : index
    %c0_211 = arith.constant 0 : index
    %361 = vector.load %arg4[%c8_209, %c0_210, %c0_211] : memref<9x2x1xf32, #tpu.memory_space<vmem>>, vector<1x2x1xf32>
    %362 = vector.shape_cast %361 : vector<1x2x1xf32> to vector<2x1xf32>
    %363 = vector.broadcast %362 : vector<2x1xf32> to vector<2x256xf32>
    %364 = arith.mulf %360, %363 : vector<2x256xf32>
    %365 = arith.addf %357, %364 : vector<2x256xf32>
    %366 = vector.broadcast %4 : vector<2x1xf32> to vector<2x256xf32>
    %367 = arith.addf %365, %366 : vector<2x256xf32>
    %cst_212 = arith.constant dense<0.000000e+00> : vector<4x256xf32>
    %368 = tpu.matmul %1, %367, %cst_212 {dimension_numbers = #tpu.dot_dimension_numbers<[1], [0], [0], [1], [0, 0, 1, 1], [], []>} : vector<4x2xf32>, vector<2x256xf32>, vector<4x256xf32> -> vector<4x256xf32>
    %369 = vector.broadcast %5 : vector<4x1xf32> to vector<4x256xf32>
    %370 = arith.addf %368, %369 : vector<4x256xf32>
    %cst_213 = arith.constant 0.000000e+00 : f32
    %371 = vector.broadcast %cst_213 : f32 to vector<4x256xf32>
    %372 = arith.maximumf %370, %371 : vector<4x256xf32>
    %cst_214 = arith.constant dense<0.000000e+00> : vector<4x256xf32>
    %373 = tpu.matmul %2, %288, %cst_214 {dimension_numbers = #tpu.dot_dimension_numbers<[1], [0], [0], [1], [0, 0, 1, 1], [], []>} : vector<4x2xf32>, vector<2x256xf32>, vector<4x256xf32> -> vector<4x256xf32>
    %374 = arith.addf %373, %372 : vector<4x256xf32>
    %c3_215 = arith.constant 3 : index
    %c0_216 = arith.constant 0 : index
    %c0_217 = arith.constant 0 : index
    %375 = vector.load %arg10[%c3_215, %c0_216, %c0_217] : memref<4x4x256xf32, #tpu.memory_space<vmem>>, vector<1x4x256xf32>
    %376 = vector.shape_cast %375 : vector<1x4x256xf32> to vector<4x256xf32>
    %377 = vector.shape_cast %374 : vector<4x256xf32> to vector<1x4x256xf32>
    tpu.vector_store %arg10[%c3_215, %c0_216, %c0_217], %377 {strides = array<i32>} : memref<4x4x256xf32, #tpu.memory_space<vmem>>, vector<1x4x256xf32>,
    return
  }
  func.func @transform_0(%arg0: i32) -> (i32, i32, i32, i32) {
    %c0_i32 = arith.constant 0 : i32
    %c0_i32_0 = arith.constant 0 : i32
    %c0_i32_1 = arith.constant 0 : i32
    %c0_i32_2 = arith.constant 0 : i32
    return %arg0, %c0_i32, %c0_i32_0, %c0_i32_1 : i32, i32, i32, i32
  }
  func.func @transform_1(%arg0: i32) -> (i32, i32) {
    %c0_i32 = arith.constant 0 : i32
    %c0_i32_0 = arith.constant 0 : i32
    %c0_i32_1 = arith.constant 0 : i32
    return %c0_i32, %c0_i32_0 : i32, i32
  }
  func.func @transform_2(%arg0: i32) -> (i32, i32) {
    %c0_i32 = arith.constant 0 : i32
    %c0_i32_0 = arith.constant 0 : i32
    %c0_i32_1 = arith.constant 0 : i32
    return %c0_i32, %c0_i32_0 : i32, i32
  }
  func.func @transform_3(%arg0: i32) -> (i32, i32, i32) {
    %c0_i32 = arith.constant 0 : i32
    %c0_i32_0 = arith.constant 0 : i32
    %c0_i32_1 = arith.constant 0 : i32
    %c0_i32_2 = arith.constant 0 : i32
    return %c0_i32, %c0_i32_0, %c0_i32_1 : i32, i32, i32
  }
  func.func @transform_4(%arg0: i32) -> (i32, i32) {
    %c0_i32 = arith.constant 0 : i32
    %c0_i32_0 = arith.constant 0 : i32
    %c0_i32_1 = arith.constant 0 : i32
    return %c0_i32, %c0_i32_0 : i32, i32
  }
  func.func @transform_5(%arg0: i32) -> (i32, i32) {
    %c0_i32 = arith.constant 0 : i32
    %c0_i32_0 = arith.constant 0 : i32
    %c0_i32_1 = arith.constant 0 : i32
    return %c0_i32, %c0_i32_0 : i32, i32
  }
  func.func @transform_6(%arg0: i32) -> (i32, i32) {
    %c0_i32 = arith.constant 0 : i32
    %c0_i32_0 = arith.constant 0 : i32
    %c0_i32_1 = arith.constant 0 : i32
    return %c0_i32, %c0_i32_0 : i32, i32
  }
  func.func @transform_7(%arg0: i32) -> (i32, i32) {
    %c0_i32 = arith.constant 0 : i32
    %c0_i32_0 = arith.constant 0 : i32
    %c0_i32_1 = arith.constant 0 : i32
    return %c0_i32, %c0_i32_0 : i32, i32
  }
  func.func @transform_8(%arg0: i32) -> (i32, i32) {
    %c0_i32 = arith.constant 0 : i32
    %c0_i32_0 = arith.constant 0 : i32
    %c0_i32_1 = arith.constant 0 : i32
    return %c0_i32, %c0_i32_0 : i32, i32
  }
  func.func @transform_9(%arg0: i32) -> (i32, i32, i32) {
    %c0_i32 = arith.constant 0 : i32
    %c0_i32_0 = arith.constant 0 : i32
    %c0_i32_1 = arith.constant 0 : i32
    return %arg0, %c0_i32, %c0_i32_0 : i32, i32, i32
  }
}

</mosaic_0001>

<bundles_post_ra>
// kernel: inverted_residual_stride1.1
= control target key start
LH: loop header
LB: loop body
LE: loop exit
PB: predicated region body
PF: predicated region fallthrough
CT: control target
= control target key end

     0   :  { %s1955_s30 = smov 0   ;;  %s2718_s0 = inlined_call_operand.vmem [shape: f32[8,2,2,256], index: 0, kind: input, shape index: {}]   ;;  %s2719_s1 = inlined_call_operand.vmem [shape: f32[2,2], index: 1, kind: input, shape index: {}]   ;;  %s2720_s2 = inlined_call_operand.vmem [shape: f32[2,1], index: 2, kind: input, shape index: {}]   ;;  %s2721_s3 = inlined_call_operand.vmem [shape: f32[9,2,1], index: 3, kind: input, shape index: {}]   ;;  %s2722_s4 = inlined_call_operand.vmem [shape: f32[2,1], index: 4, kind: input, shape index: {}]   ;;  %s2723_s5 = inlined_call_operand.vmem [shape: f32[4,2], index: 5, kind: input, shape index: {}]   ;;  %s2724_s6 = inlined_call_operand.vmem [shape: f32[4,1], index: 6, kind: input, shape index: {}]   ;;  %s2725_s7 = inlined_call_operand.vmem [shape: f32[4,2], index: 7, kind: input, shape index: {}]   ;;  %s2726_s8 = inlined_call_operand.vmem [shape: f32[9,256], index: 8, kind: input, shape index: {}]   ;;  %s2727_s9 = inlined_call_operand.vmem [shape: f32[8,4,256], index: 9, kind: output, shape index: {}]  }
   0x1 LB: > { %s1755_s10 = sadd.s32 4294967295, %s1894_s30   ;;  %p1759_p0 = scmp.ge.s32.totalorder %s1894_s30, 1  ;;  %s1894_s30 = sphi %s1955_s30, %s19_s30  }
   0x2   : > { %p289_p1 = scmp.lt.s32.totalorder %s1894_s30, 3 }
   0x4   : > { %p290_p2 = pnand %p1759_p0, %p289_p1 }
   0x5   : > { %s1760_s13 = sshll.u32 (!%p290_p2), %s1755_s10, 2  ;;  %s1897_s12 = smov (!%p290_p2), 16  }
   0x6   : > { %293 = sbr.rel (%p290_p2) target bundleno = 1417 (0x589), region = 56  ;;  %p328_p3 = scmp.lt.s32.totalorder (!%p290_p2), %s1760_s13, 7 }
   0x7   : > { %s1898_s15 = smov (!%p290_p2), 17   ;;  %s1899_s16 = smov (!%p290_p2), 15  }
   0x8   : > { %s1900_s18 = smov (!%p290_p2), 127   ;;  %s1901_s19 = smov (!%p290_p2), 1  }
   0x9   : > { %s1902_s22 = smov (!%p290_p2), 113   ;;  %s1903_s25 = smov (!%p290_p2), 112  }
   0xa   : > { %s1904_s28 = smov (!%p290_p2), 111  }
   0xb   : > { %v344_v0 = vld [vmem:[%s2720_s2] sm:$0x3]  ;;  %v1896_v1 = vmov 0   ;;  %s2731_s13 = smov (!%p328_p3, %s1760_s13), 7  ;;  %v1780_v2 = vld [vmem:[%s2721_s3 + $0x6] sm:$0x3]  ;;  %v429_v46 = vlaneseq }
   0xc   : > { %1884 = vset.pattern.permute.xlu0 %v1896_v1  ;;  %1886 = vset.pattern.permute.xlu2 %v1896_v1  ;;  %s2728_s14 = sshll.u32 %s2731_s13, 3  ;;  %vm378_vm0 = vcmask 1041408   ;;  %v1984_v5 = vld [vmem:[%s2719_s1] sm:$0x3]  ;;  %vm374_vm1 = vcmask 15360   ;;  %vm754_vm10 = vcmask 1043456  }
   0xd   : > { %367 = vperm.xlu0 %1884, %v344_v0   ;;  %1885 = vset.pattern.permute.xlu1 %v1896_v1  ;;  %s1974_s17 = scalar_lea.vmem %s2718_s0, %s2728_s14  ;;  %v1781_v6 = vld [vmem:[%s2721_s3 + $0x8] sm:$0x3]  ;;  %v1782_v10 = vld [vmem:[%s2721_s3 + $0xa] sm:$0x3]  ;;  %v1778_v13 = vld [vmem:[%s2721_s3 + $0x2] sm:$0x3] }
   0xe   : > { %v1773_v3 = vld [vmem:[%s1974_s17 + $0x4] sm:$0xf]  ;;  %v362_v4 = vld [vmem:[%s1974_s17] sm:$0xf]  ;;  %v1795_v9 = vld [vmem:[%s1974_s17 + $0xc] sm:$0xf]  ;;  %469 = vperm.xlu2 %1886, %v1778_v13  }
   0xf   : > { %371 = vst [vmem:[#allocation1] ss:$4 sm:$0xff] %v1773_v3  ;;  %v1779_v14 = vld [vmem:[%s2721_s3 + $0x4] sm:$0x3]  ;;  %v441_v15 = vld [vmem:[%s2721_s3] sm:$0x3] }
  0x10   : > { %444 = vperm.xlu1 %1885, %v441_v15   ;;  %v1783_v23 = vld [vmem:[%s2721_s3 + $0xc] sm:$0x3]  ;;  %v1784_v24 = vld [vmem:[%s2721_s3 + $0xe] sm:$0x3]  ;;  %v820_v25 = vld [vmem:[%s2721_s3] sm:$0x3] }
  0x11   : > { %v345_v26 = vld [vmem:[%s2722_s4] sm:$0x3]  ;;  %v1802_v27 = vld [vmem:[%s2721_s3 + $0x6] sm:$0x3]  ;;  %v1785_v28 = vld [vmem:[%s2721_s3 + $0x10] sm:$0x3] }
  0x12   : > { %v1803_v29 = vld [vmem:[%s2721_s3 + $0x8] sm:$0x3]  ;;  %v1800_v30 = vld [vmem:[%s2721_s3 + $0x2] sm:$0x3]  ;;  %v1804_v31 = vld [vmem:[%s2721_s3 + $0xa] sm:$0x3] }
  0x13   : > { %v1801_v32 = vld [vmem:[%s2721_s3 + $0x4] sm:$0x3]  ;;  %v2090_v48 = vand.u32 127, %v429_v46  ;;  %v1766_v50 = vld [vmem:[%s2726_s8 + $0x1] ss:$8 sm:$0x3] }
  0x14   : > { %v347_v51 = vld [vmem:[%s2726_s8] ss:$8 sm:$0x3]  ;;  %v2100_v52 = vperm.slane %v1766_v50, 0  ;;  %v2102_v53 = vperm.slane %v1766_v50, 1 }
  0x15   : > { %519 = vperm.xlu0 %1884, %v1780_v2   ;;  %vm455_vm2 = vcmp.lt.s32.totalorder %v2090_v48, 16  ;;  %vm431_vm3 = vcmp.lt.s32.totalorder %v2090_v48, 17  ;;  %v2106_v55 = vperm.slane %v347_v51, 0  ;;  %v2108_v56 = vperm.slane %v347_v51, 1 }
  0x16   : > { %v372_v7 = vld.sshfl [vmem:[#allocation1] sm:$0xff pattern:$0x73625140]  ;;  %v373_v8 = vld.sshfl [vmem:[#allocation1 + $0x8] sm:$0xff pattern:$0x73625140]  ;;  %494 = vperm.xlu2 %1886, %v1779_v14  }
  0x17   : > { %1774 = vmatpush.msk.msra.mxu0 %vm378_vm0, %v372_v7  ;;  %1776 = vmatpush.msk.msra.mxu1 %vm378_vm0, %v373_v8  ;;  %701 = vst [vmem:[#allocation1] ss:$4 sm:$0xff] %v362_v4  ;;  %v1767_v61 = vld [vmem:[%s2726_s8 + $0x2] ss:$8 sm:$0x3]  ;;  %vm480_vm4 = vcmp.lt.s32.totalorder %v2090_v48, 15 }
  0x18   : > { %1775 = vmatmul.msk.f32.vlgmr.msra.gmra.mxu0 %vm374_vm1, %v1984_v5  ;;  %1777 = vmatmul.msk.f32.vlgmr.msra.gmra.mxu1 %vm374_vm1, %v1984_v5  ;;  %v1768_v62 = vld [vmem:[%s2726_s8 + $0x3] ss:$8 sm:$0x3]  ;;  %vm505_vm5 = vcmp.lt.s32.totalorder %v2090_v48, 1  ;;  %vm541_vm6 = vcmp.lt.s32.totalorder %v2090_v48, 127  ;;  %vm566_vm7 = vcmp.lt.s32.totalorder %v2090_v48, 113 }
  0x19   : > { %v1794_v4 = vld [vmem:[%s1974_s17 + $0x8] sm:$0xf]  ;;  %v1769_v13 = vld [vmem:[%s2726_s8 + $0x5] ss:$8 sm:$0x3]  ;;  %vm591_vm8 = vcmp.lt.s32.totalorder %v2090_v48, 112 }
  0x1a   : > { %vm616_vm9 = vcmp.lt.s32.totalorder %v2090_v48, 111 }
  0x1d   : > { %530 = vperm.xlu0 %1884, %v1781_v6  }
  0x1e   : > { %v702_v11 = vld.sshfl [vmem:[#allocation1] sm:$0xff pattern:$0x73625140]  ;;  %v703_v12 = vld.sshfl [vmem:[#allocation1 + $0x8] sm:$0xff pattern:$0x73625140] }
  0x1f   : > { %763 = vst [vmem:[#allocation1] ss:$4 sm:$0xff] %v1795_v9  ;;  %1790 = vmatpush.msk.msrb.mxu0 %vm378_vm0, %v702_v11  ;;  %1792 = vmatpush.msk.msrb.mxu1 %vm378_vm0, %v703_v12  ;;  %v2135_v9 = vperm.slane %v1767_v61, 0  ;;  %v2139_v11 = vperm.slane %v1768_v62, 0  ;;  %v2141_v12 = vperm.slane %v1768_v62, 1 }
  0x25   : > { %555 = vperm.xlu0 %1884, %v1782_v10   ;;  %v2137_v10 = vperm.slane %v1767_v61, 1 }
  0x26   : > { %v2125_v1 = vld.sshfl [vmem:[#allocation1] sm:$0xff pattern:$0x73625140]  ;;  %v2131_v6 = vld.sshfl [vmem:[#allocation1 + $0x8] sm:$0xff pattern:$0x73625140] }
  0x27   : > { %1017 = vst [vmem:[#allocation1] ss:$4 sm:$0xff] %v1794_v4 }
  0x68   : > { %v470_v33 = vpop.permute.xlu2 %469 }
  0x70   : > { %v2082_v35 = vpop.permute.xlu2 %494 }
  0x7f   : > { %v2010_v16 = vpop.permute.xlu0 %367 }
  0x82   : > { %v445_v36 = vpop.permute.xlu1 %444 }
  0x87   : > { %v2080_v34 = vpop.permute.xlu0 %519 }
  0x8f   : > { %v2084_v37 = vpop.permute.xlu0 %530 }
  0x95   : > { %v400_v17 = vpop.f32.mrf.mxu0  ;;  %v420_v18 = vpop.f32.mrf.mxu1 }
  0x96   : > { %v401_v19 = vadd.f32 %v400_v17, %v2010_v16  ;;  %v421_v20 = vadd.f32 %v420_v18, %v2010_v16 }
  0x97   : > { %v2086_v40 = vpop.permute.xlu0 %555 }
  0x98   : > { %v2014_v21 = vmax.f32 %v401_v19, 0.0  ;;  %v2016_v22 = vmax.f32 %v421_v20, 0.0 }
  0x9a   : > { %453 = vrot.lane.b32.xlu2 %v2016_v22, %s1897_s12  ;;  %427 = vrot.lane.b32.xlu1 %v2016_v22, %s1898_s15 }
  0x9b   : > { %425 = vrot.lane.b32.xlu0 %v2014_v21, %s1898_s15 }
  0xa2   : > { %476 = vrot.lane.b32.xlu2 %v2014_v21, %s1899_s16  ;;  %451 = vrot.lane.b32.xlu1 %v2014_v21, %s1897_s12 }
  0xa3   : > { %478 = vrot.lane.b32.xlu0 %v2016_v22, %s1899_s16 }
  0xaa   : > { %539 = vrot.lane.b32.xlu2 %v2016_v22, %s1900_s18  ;;  %503 = vrot.lane.b32.xlu1 %v2016_v22, %s1901_s19 }
  0xab   : > { %501 = vrot.lane.b32.xlu0 %v2014_v21, %s1901_s19 }
  0xb2   : > { %564 = vrot.lane.b32.xlu2 %v2016_v22, %s1902_s22  ;;  %537 = vrot.lane.b32.xlu1 %v2014_v21, %s1900_s18 }
  0xb3   : > { %580 = vperm.xlu0 %1884, %v1783_v23   ;;  %v1770_v23 = vld [vmem:[%s2726_s8 + $0x6] ss:$8 sm:$0x3] }
  0xb4   : > { %v2183_v51 = vperm.slane %v1770_v23, 1 }
  0xba   : > { %589 = vrot.lane.b32.xlu2 %v2016_v22, %s1903_s25  ;;  %562 = vrot.lane.b32.xlu1 %v2014_v21, %s1902_s22 }
  0xbb   : > { %605 = vperm.xlu0 %1884, %v1784_v24  }
  0xc2   : > { %614 = vrot.lane.b32.xlu2 %v2016_v22, %s1904_s28  ;;  %587 = vrot.lane.b32.xlu1 %v2014_v21, %s1903_s25 }
  0xc3   : > { %823 = vperm.xlu0 %1884, %v820_v25  }
  0xca   : > { %639 = vperm.xlu2 %1886, %v345_v26   ;;  %612 = vrot.lane.b32.xlu1 %v2014_v21, %s1904_s28  ;;  %v2158_v26 = vperm.slane %v1769_v13, 0 }
  0xd2   : > { %877 = vperm.xlu2 %1886, %v1802_v27   ;;  %630 = vperm.xlu1 %1885, %v1785_v28  }
  0xda   : > { %887 = vperm.xlu2 %1886, %v1803_v29   ;;  %841 = vperm.xlu1 %1885, %v1800_v30  }
  0xe2   : > { %905 = vperm.xlu2 %1886, %v1804_v31   ;;  %859 = vperm.xlu1 %1885, %v1801_v32   ;;  %v1818_v31 = vld [vmem:[%s1974_s17 + $0x14] sm:$0xf] }
  0xf4   : > { %v454_v38 = vpop.permute.xlu2 %453 }
  0xfc   : > { %v477_v42 = vpop.permute.xlu2 %476 }
 0x104   : > { %v2088_v45 = vpop.permute.xlu2 %539 }
 0x10c   : > { %v428_v39 = vpop.permute.xlu1 %427  ;;  %v2104_v54 = vpop.permute.xlu2 %564 }
 0x10d   : > { %v426_v43 = vpop.permute.xlu0 %425 }
 0x10e   : > { %v432_v59 = vsel %vm431_vm3, %v426_v43, %v428_v39  ;;  %v433_v60 = vsel %vm431_vm3, %v428_v39, %v426_v43  ;;  %v2173_v43 = vld.sshfl [vmem:[#allocation1] sm:$0xff pattern:$0x73625140] }
 0x10f   : > { %v439_v7 = vmul.f32 %v2106_v55, %v433_v60  ;;  %v440_v8 = vmul.f32 %v2108_v56, %v432_v59 }
 0x111   : > { %v447_v24 = vmul.f32 %v445_v36, %v439_v7  ;;  %v448_v25 = vmul.f32 %v445_v36, %v440_v8  ;;  %v1771_v36 = vld [vmem:[%s2726_s8 + $0x7] ss:$8 sm:$0x3] }
 0x112   : > { %v2198_v62 = vperm.slane %v1771_v36, 1 }
 0x114   : > { %v452_v41 = vpop.permute.xlu1 %451  ;;  %v590_v32 = vpop.permute.xlu2 %589 }
 0x115   : > { %v479_v47 = vpop.permute.xlu0 %478  ;;  %v456_v57 = vsel %vm455_vm2, %v452_v41, %v454_v38  ;;  %v457_v58 = vsel %vm455_vm2, %v454_v38, %v452_v41  ;;  %v2168_v38 = vperm.slane %v1770_v23, 0 }
 0x116   : > { %v463_v2 = vmul.f32 %v2100_v52, %v457_v58  ;;  %v464_v3 = vmul.f32 %v2102_v53, %v456_v57  ;;  %v481_v14 = vsel %vm480_vm4, %v477_v42, %v479_v47  ;;  %v482_v15 = vsel %vm480_vm4, %v479_v47, %v477_v42 }
 0x117   : > { %v488_v27 = vmul.f32 %v2135_v9, %v482_v15  ;;  %v489_v28 = vmul.f32 %v2137_v10, %v481_v14  ;;  %v534_v14 = vmul.f32 %v2084_v37, %v2016_v22  ;;  %v533_v15 = vmul.f32 %v2084_v37, %v2014_v21 }
 0x118   : > { %v472_v19 = vmul.f32 %v470_v33, %v463_v2  ;;  %v473_v20 = vmul.f32 %v470_v33, %v464_v3  ;;  %v2165_v33 = vperm.slane %v1769_v13, 1  ;;  %v1772_v13 = vld [vmem:[%s2726_s8 + $0x10] ss:$8 sm:$0x3] }
 0x119   : > { %v497_v57 = vmul.f32 %v2082_v35, %v488_v27  ;;  %v498_v58 = vmul.f32 %v2082_v35, %v489_v28  ;;  %v2222_v27 = vperm.slane %v1772_v13, 1 }
 0x11a   : > { %v474_v41 = vadd.f32 %v472_v19, %v447_v24  ;;  %v475_v42 = vadd.f32 %v473_v20, %v448_v25  ;;  %v2220_v25 = vperm.slane %v1772_v13, 0  ;;  %v1823_v13 = vld [vmem:[%s2721_s3 + $0x2] sm:$0x3] }
 0x11c   : > { %v504_v44 = vpop.permute.xlu1 %503  ;;  %v500_v2 = vadd.f32 %v498_v58, %v475_v42  ;;  %v615_v24 = vpop.permute.xlu2 %614 }
 0x11d   : > { %v502_v63 = vpop.permute.xlu0 %501 }
 0x11e   : > { %v506_v17 = vsel %vm505_vm5, %v502_v63, %v504_v44  ;;  %v507_v18 = vsel %vm505_vm5, %v504_v44, %v502_v63  ;;  %v2175_v44 = vld.sshfl [vmem:[#allocation1 + $0x8] sm:$0xff pattern:$0x73625140]  ;;  %v499_v63 = vadd.f32 %v497_v57, %v474_v41 }
 0x11f   : > { %v513_v29 = vmul.f32 %v2139_v11, %v507_v18  ;;  %v514_v30 = vmul.f32 %v2141_v12, %v506_v17  ;;  %1076 = vst [vmem:[#allocation1] ss:$4 sm:$0xff] %v1818_v31 }
 0x121   : > { %v522_v59 = vmul.f32 %v2080_v34, %v513_v29  ;;  %v523_v60 = vmul.f32 %v2080_v34, %v514_v30 }
 0x123   : > { %v524_v7 = vadd.f32 %v522_v59, %v499_v63  ;;  %v525_v8 = vadd.f32 %v523_v60, %v500_v2 }
 0x124   : > { %v538_v49 = vpop.permute.xlu1 %537  ;;  %v2230_v63 = vpop.permute.xlu2 %639 }
 0x125   : > { %v542_v46 = vsel %vm541_vm6, %v538_v49, %v2088_v45  ;;  %v543_v47 = vsel %vm541_vm6, %v2088_v45, %v538_v49  ;;  %v581_v50 = vpop.permute.xlu0 %580  ;;  %v2196_v49 = vperm.slane %v1771_v36, 0  ;;  %v535_v22 = vadd.f32 %v533_v15, %v524_v7  ;;  %v1824_v15 = vld [vmem:[%s2721_s3 + $0x4] sm:$0x3] }
 0x126   : > { %v549_v35 = vmul.f32 %v2158_v26, %v542_v46  ;;  %v550_v3 = vmul.f32 %v2165_v33, %v543_v47  ;;  %v536_v28 = vadd.f32 %v534_v14, %v525_v8  ;;  %v1133_v14 = vld [vmem:[%s2721_s3] sm:$0x3] }
 0x128   : > { %v558_v18 = vmul.f32 %v2086_v40, %v549_v35  ;;  %v559_v19 = vmul.f32 %v2086_v40, %v550_v3  ;;  %v2237_v3 = vld [vmem:[%s2723_s5] sm:$0xf] }
 0x12a   : > { %v560_v31 = vadd.f32 %v558_v18, %v535_v22  ;;  %v1825_v18 = vld [vmem:[%s2721_s3 + $0x6] sm:$0x3] }
 0x12c   : > { %v563_v0 = vpop.permute.xlu1 %562 }
 0x12d   : > { %v567_v61 = vsel %vm566_vm7, %v563_v0, %v2104_v54  ;;  %v568_v45 = vsel %vm566_vm7, %v2104_v54, %v563_v0  ;;  %v606_v37 = vpop.permute.xlu0 %605 }
 0x12e   : > { %v574_v54 = vmul.f32 %v2168_v38, %v567_v61  ;;  %v575_v0 = vmul.f32 %v2183_v51, %v568_v45 }
 0x130   : > { %v583_v29 = vmul.f32 %v581_v50, %v574_v54  ;;  %v584_v21 = vmul.f32 %v581_v50, %v575_v0  ;;  %v1806_v0 = vld [vmem:[%s2721_s3 + $0xe] sm:$0x3] }
 0x132   : > { %v585_v41 = vadd.f32 %v583_v29, %v560_v31 }
 0x134   : > { %v588_v39 = vpop.permute.xlu1 %587 }
 0x135   : > { %v592_v34 = vsel %vm591_vm8, %v588_v39, %v590_v32  ;;  %v593_v4 = vsel %vm591_vm8, %v590_v32, %v588_v39  ;;  %v561_v32 = vadd.f32 %v559_v19, %v536_v28  ;;  %v1826_v19 = vld [vmem:[%s2721_s3 + $0x8] sm:$0x3]  ;;  %v824_v22 = vpop.permute.xlu0 %823 }
 0x136   : > { %v599_v20 = vmul.f32 %v2196_v49, %v592_v34  ;;  %v600_v23 = vmul.f32 %v2198_v62, %v593_v4 }
 0x137   : > { %v586_v42 = vadd.f32 %v584_v21, %v561_v32 }
 0x138   : > { %v608_v36 = vmul.f32 %v606_v37, %v599_v20  ;;  %v609_v39 = vmul.f32 %v606_v37, %v600_v23  ;;  %v1827_v20 = vld [vmem:[%s2721_s3 + $0xa] sm:$0x3] }
 0x13a   : > { %v610_v59 = vadd.f32 %v608_v36, %v585_v41  ;;  %v611_v60 = vadd.f32 %v609_v39, %v586_v42  ;;  %v2333_v39 = vld [vmem:[%s2725_s7] sm:$0xf] }
 0x13b   : > { %1793 = vmatmul.msk.f32.vlgmr.msrb.gmra.mxu1 %vm374_vm1, %v2333_v39  ;;  %1791 = vmatmul.msk.f32.vlgmr.msrb.gmra.mxu0 %vm374_vm1, %v2333_v39 }
 0x13c   : > { %v613_v17 = vpop.permute.xlu1 %612 }
 0x13d   : > { %v617_v30 = vsel %vm616_vm9, %v613_v17, %v615_v24  ;;  %v618_v40 = vsel %vm616_vm9, %v615_v24, %v613_v17  ;;  %v1807_v17 = vld [vmem:[%s2721_s3 + $0x10] sm:$0x3]  ;;  %v878_v24 = vpop.permute.xlu2 %877 }
 0x13e   : > { %v624_v46 = vmul.f32 %v2220_v25, %v617_v30  ;;  %v625_v47 = vmul.f32 %v2222_v27, %v618_v40 }
 0x144   : > { %v631_v57 = vpop.permute.xlu1 %630 }
 0x145   : > { %v633_v58 = vmul.f32 %v631_v57, %v624_v46  ;;  %v634_v50 = vmul.f32 %v631_v57, %v625_v47  ;;  %v2326_v29 = vpop.permute.xlu2 %887 }
 0x147   : > { %v635_v61 = vadd.f32 %v633_v58, %v610_v59  ;;  %v636_v45 = vadd.f32 %v634_v50, %v611_v60 }
 0x149   : > { %v642_v2 = vadd.f32 %v2230_v63, %v635_v61  ;;  %v643_v35 = vadd.f32 %v2230_v63, %v636_v45  ;;  %v2351_v45 = vld.sshfl [vmem:[#allocation1] sm:$0xff pattern:$0x73625140] }
 0x14b   : > { %1786 = vmatpush.msk.msra.mxu2 %vm378_vm0, %v642_v2  ;;  %1788 = vmatpush.msk.msra.mxu3 %vm378_vm0, %v643_v35 }
 0x14c   : > { %1787 = vmatmul.msk.f32.vlgmr.msra.gmra.mxu2 %vm374_vm1, %v2237_v3  ;;  %1789 = vmatmul.msk.f32.vlgmr.msra.gmra.mxu3 %vm374_vm1, %v2237_v3  ;;  %v842_v23 = vpop.permute.xlu1 %841 }
 0x14d   : > { %1796 = vmatpush.msk.msrb.mxu2 %vm378_vm0, %v2125_v1  ;;  %1798 = vmatpush.msk.msrb.mxu3 %vm378_vm0, %v2131_v6  ;;  %v2328_v30 = vpop.permute.xlu2 %905 }
 0x14f   : > { %1812 = vmatpush.msk.msra.mxu2 %vm378_vm0, %v2173_v43  ;;  %1814 = vmatpush.msk.msra.mxu3 %vm378_vm0, %v2175_v44  ;;  %v1805_v44 = vld [vmem:[%s2721_s3 + $0xc] sm:$0x3] }
 0x154   : > { %1797 = vmatmul.msk.f32.vlgmr.msrb.gmra.mxu2 %vm374_vm1, %v1984_v5  ;;  %1799 = vmatmul.msk.f32.vlgmr.msrb.gmra.mxu3 %vm374_vm1, %v1984_v5  ;;  %v860_v28 = vpop.permute.xlu1 %859 }
 0x15c   : > { %1813 = vmatmul.msk.f32.vlgmr.msra.gmra.mxu2 %vm374_vm1, %v2333_v39  ;;  %1815 = vmatmul.msk.f32.vlgmr.msra.gmra.mxu3 %vm374_vm1, %v2333_v39 }
 0x1cf   : > { %v2257_v34 = vpop.f32.mrf.mxu2  ;;  %v2259_v4 = vpop.f32.mrf.mxu3 }
 0x1d7   : > { %v787_v1 = vpop.f32.mrf.mxu2  ;;  %v807_v7 = vpop.f32.mrf.mxu3 }
 0x1d8   : > { %v788_v6 = vadd.f32 %v787_v1, %v2010_v16  ;;  %v808_v8 = vadd.f32 %v807_v7, %v2010_v16  ;;  %v1817_v1 = vld [vmem:[%s1974_s17 + $0x10] sm:$0xf]  ;;  %v2356_v7 = vld.sshfl [vmem:[#allocation1 + $0x8] sm:$0xff pattern:$0x73625140] }
 0x1d9   : > { %1330 = vst [vmem:[#allocation1] ss:$4 sm:$0xff] %v1817_v1 }
 0x1da   : > { %v2263_v43 = vmax.f32 %v788_v6, 0.0  ;;  %v2265_v54 = vmax.f32 %v808_v8, 0.0 }
 0x1dc   : > { %814 = vrot.lane.b32.xlu1 %v2265_v54, %s1898_s15  ;;  %830 = vrot.lane.b32.xlu2 %v2263_v43, %s1897_s12 }
 0x1dd   : > { %812 = vrot.lane.b32.xlu0 %v2263_v43, %s1898_s15 }
 0x1e4   : > { %848 = vrot.lane.b32.xlu1 %v2263_v43, %s1899_s16  ;;  %850 = vrot.lane.b32.xlu2 %v2265_v54, %s1899_s16 }
 0x1e5   : > { %832 = vrot.lane.b32.xlu0 %v2265_v54, %s1897_s12 }
 0x1ec   : > { %896 = vrot.lane.b32.xlu1 %v2265_v54, %s1900_s18  ;;  %866 = vrot.lane.b32.xlu2 %v2263_v43, %s1901_s19 }
 0x1ed   : > { %868 = vrot.lane.b32.xlu0 %v2265_v54, %s1901_s19 }
 0x1f4   : > { %914 = vrot.lane.b32.xlu1 %v2265_v54, %s1902_s22  ;;  %923 = vperm.xlu2 %1886, %v1805_v44  }
 0x1f5   : > { %894 = vrot.lane.b32.xlu0 %v2263_v43, %s1900_s18 }
 0x1fc   : > { %932 = vrot.lane.b32.xlu1 %v2265_v54, %s1903_s25  ;;  %941 = vperm.xlu2 %1886, %v1806_v0  }
 0x1fd   : > { %912 = vrot.lane.b32.xlu0 %v2263_v43, %s1902_s22 }
 0x204   : > { %950 = vrot.lane.b32.xlu1 %v2265_v54, %s1904_s28  ;;  %1154 = vperm.xlu2 %1886, %v1823_v13  }
 0x205   : > { %930 = vrot.lane.b32.xlu0 %v2263_v43, %s1903_s25 }
 0x20c   : > { %1136 = vperm.xlu1 %1885, %v1133_v14   ;;  %1172 = vperm.xlu2 %1886, %v1824_v15  }
 0x20d   : > { %948 = vrot.lane.b32.xlu0 %v2263_v43, %s1904_s28 }
 0x215   : > { %959 = vperm.xlu0 %1884, %v1807_v17  }
 0x21d   : > { %1190 = vperm.xlu0 %1884, %v1825_v18  }
 0x225   : > { %1200 = vperm.xlu0 %1884, %v1826_v19  }
 0x22d   : > { %1218 = vperm.xlu0 %1884, %v1827_v20   ;;  %v1841_v20 = vld [vmem:[%s1974_s17 + $0x1c] sm:$0xf] }
 0x236   : > { %v831_v32 = vpop.permute.xlu2 %830 }
 0x23e   : > { %v851_v42 = vpop.permute.xlu2 %850 }
 0x246   : > { %v867_v60 = vpop.permute.xlu2 %866 }
 0x24e   : > { %v815_v37 = vpop.permute.xlu1 %814 }
 0x24f   : > { %v813_v21 = vpop.permute.xlu0 %812 }
 0x250   : > { %v816_v58 = vsel %vm431_vm3, %v813_v21, %v815_v37  ;;  %v817_v50 = vsel %vm431_vm3, %v815_v37, %v813_v21 }
 0x251   : > { %v818_v6 = vmul.f32 %v817_v50, %v2106_v55  ;;  %v819_v8 = vmul.f32 %v816_v58, %v2108_v56  ;;  %v1331_v58 = vld.sshfl [vmem:[#allocation1] sm:$0xff pattern:$0x73625140]  ;;  %v1332_v50 = vld.sshfl [vmem:[#allocation1 + $0x8] sm:$0xff pattern:$0x73625140] }
 0x252   : > { %1389 = vst [vmem:[#allocation1] ss:$4 sm:$0xff] %v1841_v20 }
 0x253   : > { %v826_v18 = vmul.f32 %v824_v22, %v818_v6  ;;  %v827_v19 = vmul.f32 %v824_v22, %v819_v8 }
 0x256   : > { %v849_v31 = vpop.permute.xlu1 %848 }
 0x257   : > { %v833_v40 = vpop.permute.xlu0 %832  ;;  %v852_v44 = vsel %vm480_vm4, %v849_v31, %v851_v42  ;;  %v853_v0 = vsel %vm480_vm4, %v851_v42, %v849_v31 }
 0x258   : > { %v834_v47 = vsel %vm455_vm2, %v831_v32, %v833_v40  ;;  %v835_v57 = vsel %vm455_vm2, %v833_v40, %v831_v32  ;;  %v854_v21 = vmul.f32 %v853_v0, %v2135_v9  ;;  %v855_v37 = vmul.f32 %v852_v44, %v2137_v10 }
 0x259   : > { %v836_v2 = vmul.f32 %v835_v57, %v2100_v52  ;;  %v837_v35 = vmul.f32 %v834_v47, %v2102_v53 }
 0x25b   : > { %v844_v15 = vmul.f32 %v842_v23, %v836_v2  ;;  %v845_v17 = vmul.f32 %v842_v23, %v837_v35  ;;  %v863_v2 = vmul.f32 %v860_v28, %v855_v37 }
 0x25d   : > { %v846_v42 = vadd.f32 %v844_v15, %v826_v18  ;;  %v847_v47 = vadd.f32 %v845_v17, %v827_v19 }
 0x25e   : > { %v897_v41 = vpop.permute.xlu1 %896 }
 0x25f   : > { %v869_v36 = vpop.permute.xlu0 %868  ;;  %v865_v0 = vadd.f32 %v863_v2, %v847_v47 }
 0x260   : > { %v870_v13 = vsel %vm505_vm5, %v867_v60, %v869_v36  ;;  %v871_v14 = vsel %vm505_vm5, %v869_v36, %v867_v60  ;;  %v924_v36 = vpop.permute.xlu2 %923  ;;  %v862_v60 = vmul.f32 %v860_v28, %v854_v21 }
 0x261   : > { %v872_v40 = vmul.f32 %v871_v14, %v2139_v11  ;;  %v873_v32 = vmul.f32 %v870_v13, %v2141_v12 }
 0x262   : > { %v864_v44 = vadd.f32 %v862_v60, %v846_v42 }
 0x263   : > { %v880_v35 = vmul.f32 %v878_v24, %v872_v40  ;;  %v881_v1 = vmul.f32 %v878_v24, %v873_v32 }
 0x265   : > { %v883_v24 = vadd.f32 %v881_v1, %v865_v0 }
 0x266   : > { %v915_v59 = vpop.permute.xlu1 %914 }
 0x267   : > { %v895_v46 = vpop.permute.xlu0 %894 }
 0x268   : > { %v898_v23 = vsel %vm541_vm6, %v895_v46, %v897_v41  ;;  %v899_v22 = vsel %vm541_vm6, %v897_v41, %v895_v46  ;;  %v882_v46 = vadd.f32 %v880_v35, %v864_v44 }
 0x269   : > { %v900_v13 = vmul.f32 %v898_v23, %v2158_v26  ;;  %v901_v14 = vmul.f32 %v899_v22, %v2165_v33 }
 0x26b   : > { %v908_v19 = vmul.f32 %v2328_v30, %v900_v13  ;;  %v909_v20 = vmul.f32 %v2328_v30, %v901_v14 }
 0x26e   : > { %v933_v57 = vpop.permute.xlu1 %932 }
 0x26f   : > { %v913_v61 = vpop.permute.xlu0 %912 }
 0x270   : > { %v916_v6 = vsel %vm566_vm7, %v913_v61, %v915_v59  ;;  %v917_v8 = vsel %vm566_vm7, %v915_v59, %v913_v61  ;;  %v891_v59 = vmul.f32 %v2326_v29, %v2265_v54  ;;  %v890_v61 = vmul.f32 %v2326_v29, %v2263_v43 }
 0x271   : > { %v918_v15 = vmul.f32 %v916_v6, %v2168_v38  ;;  %v919_v17 = vmul.f32 %v917_v8, %v2183_v51 }
 0x272   : > { %v893_v40 = vadd.f32 %v891_v59, %v883_v24  ;;  %v892_v32 = vadd.f32 %v890_v61, %v882_v46  ;;  %v2427_v46 = vpop.f32.mrf.mxu1  ;;  %v1828_v61 = vld [vmem:[%s2721_s3 + $0xc] sm:$0x3] }
 0x273   : > { %v927_v42 = vmul.f32 %v924_v36, %v919_v17 }
 0x274   : > { %v910_v29 = vadd.f32 %v908_v19, %v892_v32  ;;  %v911_v23 = vadd.f32 %v909_v20, %v893_v40  ;;  %v1846_v19 = vld [vmem:[%s2721_s3 + $0x2] sm:$0x3]  ;;  %v1446_v20 = vld [vmem:[%s2721_s3] sm:$0x3]  ;;  %v1848_v40 = vld [vmem:[%s2721_s3 + $0x6] sm:$0x3] }
 0x275   : > { %v1849_v32 = vld [vmem:[%s2721_s3 + $0x8] sm:$0x3] }
 0x276   : > { %v951_v47 = vpop.permute.xlu1 %950  ;;  %v929_v2 = vadd.f32 %v927_v42, %v911_v23 }
 0x277   : > { %v931_v31 = vpop.permute.xlu0 %930 }
 0x278   : > { %v934_v41 = vsel %vm591_vm8, %v931_v31, %v933_v57  ;;  %v935_v28 = vsel %vm591_vm8, %v933_v57, %v931_v31  ;;  %v926_v31 = vmul.f32 %v924_v36, %v918_v15  ;;  %v942_v57 = vpop.permute.xlu2 %941 }
 0x279   : > { %v936_v21 = vmul.f32 %v934_v41, %v2196_v49  ;;  %v937_v37 = vmul.f32 %v935_v28, %v2198_v62 }
 0x27a   : > { %v928_v60 = vadd.f32 %v926_v31, %v910_v29  ;;  %v1850_v31 = vld [vmem:[%s2721_s3 + $0xa] sm:$0x3] }
 0x27b   : > { %v944_v22 = vmul.f32 %v942_v57, %v936_v21  ;;  %v945_v30 = vmul.f32 %v942_v57, %v937_v37  ;;  %v1847_v21 = vld [vmem:[%s2721_s3 + $0x4] sm:$0x3]  ;;  %v1830_v37 = vld [vmem:[%s2721_s3 + $0x10] sm:$0x3] }
 0x27d   : > { %v947_v36 = vadd.f32 %v945_v30, %v929_v2  ;;  %v946_v8 = vadd.f32 %v944_v22, %v928_v60 }
 0x27e   : > { %v1137_v57 = vpop.permute.xlu1 %1136 }
 0x27f   : > { %v949_v18 = vpop.permute.xlu0 %948 }
 0x280   : > { %v952_v54 = vsel %vm616_vm9, %v949_v18, %v951_v47  ;;  %v953_v43 = vsel %vm616_vm9, %v951_v47, %v949_v18  ;;  %v1829_v18 = vld [vmem:[%s2721_s3 + $0xe] sm:$0x3]  ;;  %v1155_v42 = vpop.permute.xlu2 %1154 }
 0x281   : > { %v954_v35 = vmul.f32 %v952_v54, %v2220_v25  ;;  %v955_v1 = vmul.f32 %v953_v43, %v2222_v27 }
 0x287   : > { %v960_v6 = vpop.permute.xlu0 %959 }
 0x288   : > { %v962_v44 = vmul.f32 %v960_v6, %v954_v35  ;;  %v963_v0 = vmul.f32 %v960_v6, %v955_v1  ;;  %v1173_v54 = vpop.permute.xlu2 %1172 }
 0x28a   : > { %v964_v13 = vadd.f32 %v962_v44, %v946_v8  ;;  %v965_v14 = vadd.f32 %v963_v0, %v947_v36  ;;  %v1840_v0 = vld [vmem:[%s1974_s17 + $0x18] sm:$0xf] }
 0x28c   : > { %v966_v41 = vadd.f32 %v964_v13, %v2230_v63  ;;  %v967_v28 = vadd.f32 %v965_v14, %v2230_v63 }
 0x28e   : > { %1808 = vmatpush.msk.msra.mxu0 %vm378_vm0, %v966_v41  ;;  %1810 = vmatpush.msk.msra.mxu1 %vm378_vm0, %v967_v28 }
 0x28f   : > { %1811 = vmatmul.msk.f32.vlgmr.msra.gmra.mxu1 %vm374_vm1, %v2237_v3  ;;  %1809 = vmatmul.msk.f32.vlgmr.msra.gmra.mxu0 %vm374_vm1, %v2237_v3  ;;  %v1191_v47 = vpop.permute.xlu0 %1190 }
 0x290   : > { %1819 = vmatpush.msk.msrb.mxu0 %vm378_vm0, %v2351_v45  ;;  %1821 = vmatpush.msk.msrb.mxu1 %vm378_vm0, %v2356_v7  ;;  %v2425_v45 = vpop.f32.mrf.mxu0 }
 0x292   : > { %1835 = vmatpush.msk.msra.mxu0 %vm378_vm0, %v1331_v58  ;;  %1837 = vmatpush.msk.msra.mxu1 %vm378_vm0, %v1332_v50 }
 0x297   : > { %1822 = vmatmul.msk.f32.vlgmr.msrb.gmra.mxu1 %vm374_vm1, %v1984_v5  ;;  %1820 = vmatmul.msk.f32.vlgmr.msrb.gmra.mxu0 %vm374_vm1, %v1984_v5  ;;  %v1201_v43 = vpop.permute.xlu0 %1200 }
 0x29f   : > { %1836 = vmatmul.msk.f32.vlgmr.msra.gmra.mxu0 %vm374_vm1, %v2333_v39  ;;  %1838 = vmatmul.msk.f32.vlgmr.msra.gmra.mxu1 %vm374_vm1, %v2333_v39  ;;  %v1219_v22 = vpop.permute.xlu0 %1218 }
 0x30c   : > { %v2429_v7 = vpop.f32.mrf.mxu0  ;;  %v2431_v58 = vpop.f32.mrf.mxu1 }
 0x314   : > { %v1100_v50 = vpop.f32.mrf.mxu0  ;;  %v1120_v24 = vpop.f32.mrf.mxu1 }
 0x315   : > { %v1101_v15 = vadd.f32 %v1100_v50, %v2010_v16  ;;  %v1121_v5 = vadd.f32 %v1120_v24, %v2010_v16 }
 0x317   : > { %v2435_v17 = vmax.f32 %v1101_v15, 0.0  ;;  %v2437_v59 = vmax.f32 %v1121_v5, 0.0  ;;  %v2509_v5 = vld.sshfl [vmem:[#allocation1] sm:$0xff pattern:$0x73625140] }
 0x319   : > { %1127 = vrot.lane.b32.xlu2 %v2437_v59, %s1898_s15  ;;  %1143 = vrot.lane.b32.xlu0 %v2435_v17, %s1897_s12 }
 0x31a   : > { %1125 = vrot.lane.b32.xlu1 %v2435_v17, %s1898_s15 }
 0x321   : > { %1161 = vrot.lane.b32.xlu2 %v2435_v17, %s1899_s16  ;;  %1163 = vrot.lane.b32.xlu0 %v2437_v59, %s1899_s16 }
 0x322   : > { %1145 = vrot.lane.b32.xlu1 %v2437_v59, %s1897_s12 }
 0x329   : > { %1209 = vrot.lane.b32.xlu2 %v2437_v59, %s1900_s18  ;;  %1179 = vrot.lane.b32.xlu0 %v2435_v17, %s1901_s19 }
 0x32a   : > { %1181 = vrot.lane.b32.xlu1 %v2437_v59, %s1901_s19 }
 0x331   : > { %1227 = vrot.lane.b32.xlu2 %v2437_v59, %s1902_s22  ;;  %1236 = vperm.xlu0 %1884, %v1828_v61   ;;  %v2511_v61 = vld.sshfl [vmem:[#allocation1 + $0x8] sm:$0xff pattern:$0x73625140] }
 0x332   : > { %1207 = vrot.lane.b32.xlu1 %v2435_v17, %s1900_s18  ;;  %1643 = vst [vmem:[#allocation1] ss:$4 sm:$0xff] %v1840_v0 }
 0x339   : > { %1245 = vrot.lane.b32.xlu2 %v2437_v59, %s1903_s25  ;;  %1254 = vperm.xlu0 %1884, %v1829_v18  }
 0x33a   : > { %1225 = vrot.lane.b32.xlu1 %v2435_v17, %s1902_s22 }
 0x341   : > { %1263 = vrot.lane.b32.xlu2 %v2437_v59, %s1904_s28  ;;  %1467 = vperm.xlu0 %1884, %v1846_v19  }
 0x342   : > { %1243 = vrot.lane.b32.xlu1 %v2435_v17, %s1903_s25 }
 0x349   : > { %1449 = vperm.xlu2 %1886, %v1446_v20   ;;  %1485 = vperm.xlu0 %1884, %v1847_v21  }
 0x34a   : > { %1261 = vrot.lane.b32.xlu1 %v2435_v17, %s1904_s28 }
 0x352   : > { %1272 = vperm.xlu1 %1885, %v1830_v37  }
 0x35a   : > { %1503 = vperm.xlu1 %1885, %v1848_v40  }
 0x362   : > { %1513 = vperm.xlu1 %1885, %v1849_v32  }
 0x36a   : > { %1531 = vperm.xlu1 %1885, %v1850_v31  }
 0x373   : > { %v1128_v23 = vpop.permute.xlu2 %1127 }
 0x37b   : > { %v1162_v60 = vpop.permute.xlu2 %1161 }
 0x383   : > { %v1210_v1 = vpop.permute.xlu2 %1209 }
 0x38b   : > { %v1144_v2 = vpop.permute.xlu0 %1143  ;;  %v1228_v13 = vpop.permute.xlu2 %1227 }
 0x38c   : > { %v1126_v29 = vpop.permute.xlu1 %1125 }
 0x38d   : > { %v1129_v14 = vsel %vm431_vm3, %v1126_v29, %v1128_v23  ;;  %v1130_v41 = vsel %vm431_vm3, %v1128_v23, %v1126_v29 }
 0x38e   : > { %v1131_v18 = vmul.f32 %v1130_v41, %v2106_v55  ;;  %v1132_v19 = vmul.f32 %v1129_v14, %v2108_v56 }
 0x390   : > { %v1139_v29 = vmul.f32 %v1137_v57, %v1131_v18  ;;  %v1140_v23 = vmul.f32 %v1137_v57, %v1132_v19 }
 0x393   : > { %v1164_v6 = vpop.permute.xlu0 %1163 }
 0x394   : > { %v1146_v30 = vpop.permute.xlu1 %1145  ;;  %v1165_v20 = vsel %vm480_vm4, %v1162_v60, %v1164_v6  ;;  %v1166_v21 = vsel %vm480_vm4, %v1164_v6, %v1162_v60  ;;  %v1246_v60 = vpop.permute.xlu2 %1245 }
 0x395   : > { %v1147_v8 = vsel %vm455_vm2, %v1144_v2, %v1146_v30  ;;  %v1148_v44 = vsel %vm455_vm2, %v1146_v30, %v1144_v2  ;;  %v1167_v30 = vmul.f32 %v1166_v21, %v2135_v9  ;;  %v1168_v2 = vmul.f32 %v1165_v20, %v2137_v10 }
 0x396   : > { %v1149_v24 = vmul.f32 %v1148_v44, %v2100_v52  ;;  %v1150_v15 = vmul.f32 %v1147_v8, %v2102_v53 }
 0x397   : > { %v1175_v57 = vmul.f32 %v1173_v54, %v1167_v30 }
 0x398   : > { %v1157_v32 = vmul.f32 %v1155_v42, %v1149_v24  ;;  %v1158_v31 = vmul.f32 %v1155_v42, %v1150_v15 }
 0x39a   : > { %v1159_v6 = vadd.f32 %v1157_v32, %v1139_v29  ;;  %v1160_v14 = vadd.f32 %v1158_v31, %v1140_v23 }
 0x39b   : > { %v1180_v28 = vpop.permute.xlu0 %1179 }
 0x39c   : > { %v1182_v35 = vpop.permute.xlu1 %1181  ;;  %v1177_v20 = vadd.f32 %v1175_v57, %v1159_v6 }
 0x39d   : > { %v1183_v37 = vsel %vm505_vm5, %v1180_v28, %v1182_v35  ;;  %v1184_v40 = vsel %vm505_vm5, %v1182_v35, %v1180_v28  ;;  %v1176_v28 = vmul.f32 %v1173_v54, %v1168_v2 }
 0x39e   : > { %v1185_v8 = vmul.f32 %v1184_v40, %v2139_v11  ;;  %v1186_v44 = vmul.f32 %v1183_v37, %v2141_v12 }
 0x39f   : > { %v1178_v21 = vadd.f32 %v1176_v28, %v1160_v14 }
 0x3a0   : > { %v1193_v24 = vmul.f32 %v1191_v47, %v1185_v8  ;;  %v1194_v15 = vmul.f32 %v1191_v47, %v1186_v44  ;;  %v1264_v44 = vpop.permute.xlu2 %1263 }
 0x3a2   : > { %v1196_v47 = vadd.f32 %v1194_v15, %v1178_v21 }
 0x3a3   : > { %v1237_v41 = vpop.permute.xlu0 %1236 }
 0x3a4   : > { %v1208_v36 = vpop.permute.xlu1 %1207 }
 0x3a5   : > { %v1211_v35 = vsel %vm541_vm6, %v1208_v36, %v1210_v1  ;;  %v1212_v42 = vsel %vm541_vm6, %v1210_v1, %v1208_v36  ;;  %v1195_v1 = vadd.f32 %v1193_v24, %v1177_v20 }
 0x3a6   : > { %v1213_v37 = vmul.f32 %v1211_v35, %v2158_v26  ;;  %v1214_v40 = vmul.f32 %v1212_v42, %v2165_v33 }
 0x3a8   : > { %v1221_v23 = vmul.f32 %v1219_v22, %v1213_v37  ;;  %v1222_v30 = vmul.f32 %v1219_v22, %v1214_v40 }
 0x3ab   : > { %v1255_v35 = vpop.permute.xlu0 %1254 }
 0x3ac   : > { %v1226_v50 = vpop.permute.xlu1 %1225 }
 0x3ad   : > { %v1229_v18 = vsel %vm566_vm7, %v1226_v50, %v1228_v13  ;;  %v1230_v19 = vsel %vm566_vm7, %v1228_v13, %v1226_v50  ;;  %v1204_v13 = vmul.f32 %v1201_v43, %v2437_v59  ;;  %v1203_v50 = vmul.f32 %v1201_v43, %v2435_v17 }
 0x3ae   : > { %v1231_v36 = vmul.f32 %v1229_v18, %v2168_v38  ;;  %v1232_v31 = vmul.f32 %v1230_v19, %v2183_v51 }
 0x3af   : > { %v1206_v6 = vadd.f32 %v1204_v13, %v1196_v47  ;;  %v1887_v47 = vld [vmem:[%s2719_s1] sm:$0x3] }
 0x3b0   : > { %v1240_v14 = vmul.f32 %v1237_v41, %v1232_v31  ;;  %v2572_v31 = vpop.f32.mrf.mxu3 }
 0x3b1   : > { %v1224_v43 = vadd.f32 %v1222_v30, %v1206_v6  ;;  %v1853_v6 = vld [vmem:[%s2721_s3 + $0x10] sm:$0x3] }
 0x3b3   : > { %v1242_v24 = vadd.f32 %v1240_v14, %v1224_v43 }
 0x3b4   : > { %v1244_v0 = vpop.permute.xlu1 %1243 }
 0x3b5   : > { %v1247_v32 = vsel %vm591_vm8, %v1244_v0, %v1246_v60  ;;  %v1248_v54 = vsel %vm591_vm8, %v1246_v60, %v1244_v0  ;;  %v1205_v0 = vadd.f32 %v1203_v50, %v1195_v1  ;;  %v1239_v60 = vmul.f32 %v1237_v41, %v1231_v36  ;;  %v2570_v36 = vpop.f32.mrf.mxu2 }
 0x3b6   : > { %v1249_v2 = vmul.f32 %v1247_v32, %v2196_v49  ;;  %v1250_v8 = vmul.f32 %v1248_v54, %v2198_v62 }
 0x3b7   : > { %v1223_v17 = vadd.f32 %v1221_v23, %v1205_v0  ;;  %v1450_v0 = vpop.permute.xlu2 %1449 }
 0x3b8   : > { %v1257_v57 = vmul.f32 %v1255_v35, %v1249_v2  ;;  %v1258_v22 = vmul.f32 %v1255_v35, %v1250_v8  ;;  %v1852_v8 = vld [vmem:[%s2721_s3 + $0xe] sm:$0x3]  ;;  %v1468_v35 = vpop.permute.xlu0 %1467 }
 0x3b9   : > { %v1241_v28 = vadd.f32 %v1239_v60, %v1223_v17 }
 0x3ba   : > { %v1260_v20 = vadd.f32 %v1258_v22, %v1242_v24 }
 0x3bb   : > { %v1259_v41 = vadd.f32 %v1257_v57, %v1241_v28 }
 0x3bc   : > { %v1262_v29 = vpop.permute.xlu1 %1261 }
 0x3bd   : > { %v1265_v42 = vsel %vm616_vm9, %v1262_v29, %v1264_v44  ;;  %v1266_v59 = vsel %vm616_vm9, %v1264_v44, %v1262_v29  ;;  %v346_v44 = vld [vmem:[%s2724_s6] sm:$0xf] }
 0x3be   : > { %v1267_v15 = vmul.f32 %v1265_v42, %v2220_v25  ;;  %v1268_v18 = vmul.f32 %v1266_v59, %v2222_v27 }
 0x3c0   : > { %v1486_v17 = vpop.permute.xlu0 %1485 }
 0x3c4   : > { %v1273_v19 = vpop.permute.xlu1 %1272 }
 0x3c5   : > { %v1275_v21 = vmul.f32 %v1273_v19, %v1267_v15  ;;  %v1276_v37 = vmul.f32 %v1273_v19, %v1268_v18 }
 0x3c7   : > { %v1277_v40 = vadd.f32 %v1275_v21, %v1259_v41  ;;  %v1278_v32 = vadd.f32 %v1276_v37, %v1260_v20  ;;  %v1644_v37 = vld.sshfl [vmem:[#allocation1] sm:$0xff pattern:$0x73625140] }
 0x3c9   : > { %v1279_v54 = vadd.f32 %v1277_v40, %v2230_v63  ;;  %v1280_v1 = vadd.f32 %v1278_v32, %v2230_v63  ;;  %v1645_v40 = vld.sshfl [vmem:[#allocation1 + $0x8] sm:$0xff pattern:$0x73625140] }
 0x3cb   : > { %1831 = vmatpush.msk.msrb.mxu2 %vm378_vm0, %v1279_v54  ;;  %1833 = vmatpush.msk.msrb.mxu3 %vm378_vm0, %v1280_v1 }
 0x3cc   : > { %1834 = vmatmul.msk.f32.vlgmr.msrb.gmra.mxu3 %vm374_vm1, %v2237_v3  ;;  %1832 = vmatmul.msk.f32.vlgmr.msrb.gmra.mxu2 %vm374_vm1, %v2237_v3  ;;  %v1504_v60 = vpop.permute.xlu1 %1503 }
 0x3cd   : > { %1842 = vmatpush.msk.msra.mxu2 %vm378_vm0, %v2509_v5  ;;  %1844 = vmatpush.msk.msra.mxu3 %vm378_vm0, %v2511_v61 }
 0x3cf   : > { %1858 = vmatpush.msk.msrb.mxu2 %vm378_vm0, %v1644_v37  ;;  %1860 = vmatpush.msk.msrb.mxu3 %vm378_vm0, %v1645_v40 }
 0x3d4   : > { %1845 = vmatmul.msk.f32.vlgmr.msra.gmra.mxu3 %vm374_vm1, %v1887_v47  ;;  %1843 = vmatmul.msk.f32.vlgmr.msra.gmra.mxu2 %vm374_vm1, %v1887_v47  ;;  %v1514_v42 = vpop.permute.xlu1 %1513 }
 0x3dc   : > { %v2628_v43 = vpop.permute.xlu1 %1531  ;;  %1859 = vmatmul.msk.f32.vlgmr.msrb.gmra.mxu2 %vm374_vm1, %v2333_v39  ;;  %1861 = vmatmul.msk.f32.vlgmr.msrb.gmra.mxu3 %vm374_vm1, %v2333_v39 }
 0x44f   : > { %v2574_v13 = vpop.f32.mrf.mxu2  ;;  %v2576_v50 = vpop.f32.mrf.mxu3 }
 0x457   : > { %v1413_v5 = vpop.f32.mrf.mxu2  ;;  %v1433_v29 = vpop.f32.mrf.mxu3 }
 0x458   : > { %v1414_v61 = vadd.f32 %v1413_v5, %v2010_v16  ;;  %v1434_v23 = vadd.f32 %v1433_v29, %v2010_v16  ;;  %v1851_v16 = vld [vmem:[%s2721_s3 + $0xc] sm:$0x3] }
 0x45a   : > { %v2580_v30 = vmax.f32 %v1414_v61, 0.0  ;;  %v2582_v2 = vmax.f32 %v1434_v23, 0.0 }
 0x45c   : > { %1440 = vrot.lane.b32.xlu0 %v2582_v2, %s1898_s15  ;;  %1456 = vrot.lane.b32.xlu1 %v2580_v30, %s1897_s12 }
 0x45d   : > { %1438 = vrot.lane.b32.xlu2 %v2580_v30, %s1898_s15 }
 0x464   : > { %1474 = vrot.lane.b32.xlu0 %v2580_v30, %s1899_s16  ;;  %1476 = vrot.lane.b32.xlu1 %v2582_v2, %s1899_s16 }
 0x465   : > { %1458 = vrot.lane.b32.xlu2 %v2582_v2, %s1897_s12 }
 0x46c   : > { %1522 = vrot.lane.b32.xlu0 %v2582_v2, %s1900_s18  ;;  %1492 = vrot.lane.b32.xlu1 %v2580_v30, %s1901_s19 }
 0x46d   : > { %1494 = vrot.lane.b32.xlu2 %v2582_v2, %s1901_s19 }
 0x474   : > { %1540 = vrot.lane.b32.xlu0 %v2582_v2, %s1902_s22  ;;  %1549 = vperm.xlu1 %1885, %v1851_v16  }
 0x475   : > { %1520 = vrot.lane.b32.xlu2 %v2580_v30, %s1900_s18 }
 0x47c   : > { %1558 = vrot.lane.b32.xlu0 %v2582_v2, %s1903_s25  ;;  %1567 = vperm.xlu1 %1885, %v1852_v8  }
 0x47d   : > { %1538 = vrot.lane.b32.xlu2 %v2580_v30, %s1902_s22  ;;  %s2729_s22 = sshll.u32 %s2731_s13, 3 }
 0x47e   : > { %s339_s14 = scalar_lea.vmem %s2727_s9, %s2729_s22 }
 0x484   : > { %1576 = vrot.lane.b32.xlu0 %v2582_v2, %s1904_s28 }
 0x485   : > { %1556 = vrot.lane.b32.xlu2 %v2580_v30, %s1903_s25 }
 0x48c   : > { %646 = vperm.xlu0 %1884, %v346_v44  }
 0x48d   : > { %1574 = vrot.lane.b32.xlu2 %v2580_v30, %s1904_s28 }
 0x495   : > { %1585 = vperm.xlu2 %1886, %v1853_v6  }
 0x4b7   : > { %v1439_v14 = vpop.permute.xlu2 %1438 }
 0x4bf   : > { %v1459_v59 = vpop.permute.xlu2 %1458 }
 0x4c7   : > { %v1495_v57 = vpop.permute.xlu2 %1494 }
 0x4ce   : > { %v1441_v22 = vpop.permute.xlu0 %1440  ;;  %v1457_v28 = vpop.permute.xlu1 %1456 }
 0x4cf   : > { %v1521_v24 = vpop.permute.xlu2 %1520  ;;  %v1443_v20 = vsel %vm431_vm3, %v1441_v22, %v1439_v14  ;;  %v1442_v41 = vsel %vm431_vm3, %v1439_v14, %v1441_v22  ;;  %v1460_v32 = vsel %vm455_vm2, %v1457_v28, %v1459_v59  ;;  %v1461_v54 = vsel %vm455_vm2, %v1459_v59, %v1457_v28 }
 0x4d0   : > { %v1444_v1 = vmul.f32 %v1443_v20, %v2106_v55  ;;  %v1445_v5 = vmul.f32 %v1442_v41, %v2108_v56  ;;  %v1462_v23 = vmul.f32 %v1461_v54, %v2100_v52  ;;  %v1463_v55 = vmul.f32 %v1460_v32, %v2102_v53 }
 0x4d2   : > { %v1452_v6 = vmul.f32 %v1450_v0, %v1444_v1  ;;  %v1453_v14 = vmul.f32 %v1450_v0, %v1445_v5  ;;  %v1470_v22 = vmul.f32 %v1468_v35, %v1462_v23  ;;  %v1471_v28 = vmul.f32 %v1468_v35, %v1463_v55 }
 0x4d3   : > { %v1516_v1 = vmul.f32 %v1514_v42, %v2580_v30 }
 0x4d4   : > { %v1472_v20 = vadd.f32 %v1470_v22, %v1452_v6  ;;  %v1473_v41 = vadd.f32 %v1471_v28, %v1453_v14 }
 0x4d6   : > { %v1475_v15 = vpop.permute.xlu0 %1474  ;;  %v1477_v18 = vpop.permute.xlu1 %1476 }
 0x4d7   : > { %v1539_v19 = vpop.permute.xlu2 %1538  ;;  %v1478_v29 = vsel %vm480_vm4, %v1475_v15, %v1477_v18  ;;  %v1479_v61 = vsel %vm480_vm4, %v1477_v18, %v1475_v15 }
 0x4d8   : > { %v1480_v8 = vmul.f32 %v1479_v61, %v2135_v9  ;;  %v1481_v44 = vmul.f32 %v1478_v29, %v2137_v10 }
 0x4da   : > { %v1488_v15 = vmul.f32 %v1486_v17, %v1480_v8  ;;  %v1489_v18 = vmul.f32 %v1486_v17, %v1481_v44 }
 0x4dc   : > { %v1490_v9 = vadd.f32 %v1488_v15, %v1472_v20  ;;  %v1491_v32 = vadd.f32 %v1489_v18, %v1473_v41 }
 0x4de   : > { %v1523_v21 = vpop.permute.xlu0 %1522  ;;  %v1493_v47 = vpop.permute.xlu1 %1492 }
 0x4df   : > { %v1496_v16 = vsel %vm505_vm5, %v1493_v47, %v1495_v57  ;;  %v1497_v56 = vsel %vm505_vm5, %v1495_v57, %v1493_v47  ;;  %v1557_v59 = vpop.permute.xlu2 %1556  ;;  %v1524_v10 = vsel %vm541_vm6, %v1521_v24, %v1523_v21  ;;  %v1525_v0 = vsel %vm541_vm6, %v1523_v21, %v1521_v24 }
 0x4e0   : > { %v1498_v39 = vmul.f32 %v1497_v56, %v2139_v11  ;;  %v1499_v52 = vmul.f32 %v1496_v16, %v2141_v12  ;;  %v1526_v21 = vmul.f32 %v1524_v10, %v2158_v26  ;;  %v1527_v29 = vmul.f32 %v1525_v0, %v2165_v33 }
 0x4e2   : > { %v1506_v37 = vmul.f32 %v1504_v60, %v1498_v39  ;;  %v1507_v57 = vmul.f32 %v1504_v60, %v1499_v52  ;;  %v1517_v60 = vmul.f32 %v1514_v42, %v2582_v2  ;;  %v1534_v42 = vmul.f32 %v2628_v43, %v1526_v21 }
 0x4e3   : > { %v1535_v16 = vmul.f32 %v2628_v43, %v1527_v29 }
 0x4e4   : > { %v1508_v35 = vadd.f32 %v1506_v37, %v1490_v9  ;;  %v1509_v17 = vadd.f32 %v1507_v57, %v1491_v32 }
 0x4e6   : > { %v1541_v53 = vpop.permute.xlu0 %1540  ;;  %v1550_v40 = vpop.permute.xlu1 %1549  ;;  %v1518_v23 = vadd.f32 %v1516_v1, %v1508_v35  ;;  %v1519_v55 = vadd.f32 %v1517_v60, %v1509_v17 }
 0x4e7   : > { %v1542_v11 = vsel %vm566_vm7, %v1539_v19, %v1541_v53  ;;  %v1543_v12 = vsel %vm566_vm7, %v1541_v53, %v1539_v19  ;;  %v1575_v47 = vpop.permute.xlu2 %1574 }
 0x4e8   : > { %v1544_v19 = vmul.f32 %v1542_v11, %v2168_v38  ;;  %v1545_v61 = vmul.f32 %v1543_v12, %v2183_v51  ;;  %v1536_v26 = vadd.f32 %v1534_v42, %v1518_v23  ;;  %v1537_v6 = vadd.f32 %v1535_v16, %v1519_v55  ;;  %v1354_v12 = vpop.f32.mrf.mxu0 }
 0x4ea   : > { %v1552_v56 = vmul.f32 %v1550_v40, %v1544_v19  ;;  %v1553_v8 = vmul.f32 %v1550_v40, %v1545_v61 }
 0x4ee   : > { %v1559_v54 = vpop.permute.xlu0 %1558  ;;  %v1568_v44 = vpop.permute.xlu1 %1567 }
 0x4ef   : > { %v1560_v5 = vsel %vm591_vm8, %v1557_v59, %v1559_v54  ;;  %v1561_v24 = vsel %vm591_vm8, %v1559_v54, %v1557_v59  ;;  %v1554_v59 = vadd.f32 %v1552_v56, %v1536_v26  ;;  %v1586_v28 = vpop.permute.xlu2 %1585 }
 0x4f0   : > { %v1562_v2 = vmul.f32 %v1560_v5, %v2196_v49  ;;  %v1563_v30 = vmul.f32 %v1561_v24, %v2198_v62  ;;  %v1555_v62 = vadd.f32 %v1553_v8, %v1537_v6 }
 0x4f2   : > { %v1570_v33 = vmul.f32 %v1568_v44, %v1562_v2  ;;  %v1571_v14 = vmul.f32 %v1568_v44, %v1563_v30 }
 0x4f4   : > { %v1572_v39 = vadd.f32 %v1570_v33, %v1554_v59  ;;  %v1573_v52 = vadd.f32 %v1571_v14, %v1555_v62 }
 0x4f6   : > { %v1577_v38 = vpop.permute.xlu0 %1576 }
 0x4f7   : > { %v1578_v51 = vsel %vm616_vm9, %v1575_v47, %v1577_v38  ;;  %v1579_v49 = vsel %vm616_vm9, %v1577_v38, %v1575_v47 }
 0x4f8   : > { %v1580_v22 = vmul.f32 %v1578_v51, %v2220_v25  ;;  %v1581_v43 = vmul.f32 %v1579_v49, %v2222_v27 }
 0x4fa   : > { %v1588_v53 = vmul.f32 %v1586_v28, %v1580_v22  ;;  %v1589_v15 = vmul.f32 %v1586_v28, %v1581_v43 }
 0x4fc   : > { %v1590_v18 = vadd.f32 %v1588_v53, %v1572_v39  ;;  %v1591_v20 = vadd.f32 %v1589_v15, %v1573_v52 }
 0x4fe   : > { %v1592_v41 = vadd.f32 %v1590_v18, %v2230_v63  ;;  %v1593_v37 = vadd.f32 %v1591_v20, %v2230_v63  ;;  %v647_v57 = vpop.permute.xlu0 %646 }
 0x4ff   : > { %v676_v48 = vadd.f32 %v2257_v34, %v647_v57  ;;  %v696_v40 = vadd.f32 %v2259_v4, %v647_v57  ;;  %v992_v25 = vadd.f32 %v2429_v7, %v647_v57  ;;  %v1012_v27 = vadd.f32 %v2431_v58, %v647_v57  ;;  %v1374_v34 = vpop.f32.mrf.mxu1 }
 0x500   : > { %1854 = vmatpush.msk.msrb.mxu0 %vm378_vm0, %v1592_v41  ;;  %1856 = vmatpush.msk.msrb.mxu1 %vm378_vm0, %v1593_v37  ;;  %v1305_v9 = vadd.f32 %v2574_v13, %v647_v57  ;;  %v1325_v32 = vadd.f32 %v2576_v50, %v647_v57 }
 0x501   : > { %v698_v10 = vmax.f32 %v676_v48, 0.0  ;;  %v699_v63 = vmax.f32 %v696_v40, 0.0  ;;  %v1014_v0 = vmax.f32 %v992_v25, 0.0  ;;  %v1015_v11 = vmax.f32 %v1012_v27, 0.0  ;;  %1855 = vmatmul.msk.f32.vlgmr.msrb.gmra.mxu0 %vm374_vm1, %v2237_v3  ;;  %1857 = vmatmul.msk.f32.vlgmr.msrb.gmra.mxu1 %vm374_vm1, %v2237_v3 }
 0x502   : > { %v1328_v4 = vmax.f32 %v1325_v32, 0.0  ;;  %v1327_v58 = vmax.f32 %v1305_v9, 0.0 }
 0x503   : > { %v749_v7 = vadd.f32 %v2427_v46, %v699_v63  ;;  %v1062_v13 = vadd.f32 %v2572_v31, %v1015_v11  ;;  %v729_v35 = vadd.f32 %v2425_v45, %v698_v10  ;;  %v1042_v3 = vadd.f32 %v2570_v36, %v1014_v0  ;;  %v1687_v45 = vpop.f32.mrf.mxu3  ;;  %v1667_v36 = vpop.f32.mrf.mxu2 }
 0x504   : > { %v1375_v50 = vadd.f32 %v1374_v34, %v1328_v4  ;;  %v1355_v1 = vadd.f32 %v1354_v12, %v1327_v58 }
 0x505   : > { %v753_v17 = vrot.slane %v749_v7, 4  ;;  %v1066_v54 = vrot.slane %v1062_v13, 4 }
 0x506   : > { %v1379_v60 = vrot.slane %v1375_v50, 4 }
 0x507   : > { %v755_v46 = vsel %vm754_vm10, %v729_v35, %v753_v17  ;;  %v1067_v31 = vsel %vm754_vm10, %v1042_v3, %v1066_v54 }
 0x508   : > { %757 = vst [vmem:[%s339_s14] sm:$0xff] %v755_v46  ;;  %v1380_v47 = vsel %vm754_vm10, %v1355_v1, %v1379_v60 }
 0x509   : > { %1816 = vst [vmem:[%s339_s14 + $0x8] sm:$0xff] %v1067_v31 }
 0x50a   : > { %1839 = vst [vmem:[%s339_s14 + $0x10] sm:$0xff] %v1380_v47 }
 0x57e   : > { %v1617_v5 = vpop.f32.mrf.mxu0  ;;  %v1637_v24 = vpop.f32.mrf.mxu1 }
 0x57f   : > { %v1618_v21 = vadd.f32 %v1617_v5, %v647_v57  ;;  %v1638_v29 = vadd.f32 %v1637_v24, %v647_v57 }
 0x581   : > { %v1640_v19 = vmax.f32 %v1618_v21, 0.0  ;;  %v1641_v61 = vmax.f32 %v1638_v29, 0.0 }
 0x583   : > { %v1688_v23 = vadd.f32 %v1687_v45, %v1641_v61  ;;  %v1668_v55 = vadd.f32 %v1667_v36, %v1640_v19 }
 0x585   : > { %v1692_v2 = vrot.slane %v1688_v23, 4 }
 0x587   : > { %v1693_v30 = vsel %vm754_vm10, %v1668_v55, %v1692_v2 }
 0x588   : > { %1862 = vst [vmem:[%s339_s14 + $0x18] sm:$0xff] %v1693_v30 }
 0x589 PF: > { %s19_s30 = sadd.s32 1, %s1894_s30  }
 0x58a   : > { %p16_p4 = scmp.ge.s32.totalorder %s19_s30, 4  }
 0x58c   :  { %18 = sbr.rel (!%p16_p4) target bundleno = 1 (0x1), region = 111 }

</bundles_post_ra>
